<compile_context>
chip_gen: v6e
topology: v6e:2x2x1
jax: 0.10.0
libtpu: 0.0.40
codegen_flags: <defaults>
</compile_context>

<pallas_src>
import functools

import jax
import jax.numpy as jnp
from jax.experimental import pallas as pl
from jax.experimental.pallas import tpu as pltpu

RALPHA = 0.2      # LeakyReLU negative slope (args.ralpha)
BN_EPS = 1e-5     # nn.BatchNorm1d default eps


def _leaky(y):
    # f32 epilogue (v5e has no bf16 VPU).
    return jnp.where(y > 0, y, RALPHA * y)


def encoder_kernel(x_ref, w1_ref, b1_ref, w2_ref, b2_ref, w3_ref, b3_ref,
                   s3_ref, t3_ref, out_ref):
    """3-layer MLP tile: (TB, D_in) -> (TB, d_out). BN of layers 1/2 pre-folded."""
    x = x_ref[...]
    h1 = jnp.dot(x, w1_ref[...], preferred_element_type=jnp.float32) + b1_ref[...]
    h1 = _leaky(h1)
    h2 = jnp.dot(h1.astype(w2_ref.dtype), w2_ref[...],
                 preferred_element_type=jnp.float32) + b2_ref[...]
    h2 = _leaky(h2)
    y3 = jnp.dot(h2.astype(w3_ref.dtype), w3_ref[...],
                 preferred_element_type=jnp.float32) + b3_ref[...]
    y3 = _leaky(y3)
    # Final layer's folded eval-mode BatchNorm1d (explicit scale / shift).
    out_ref[...] = (y3 * s3_ref[...] + t3_ref[...]).astype(out_ref.dtype)


def _round_up(x, m):
    return ((x + m - 1) // m) * m


def _choose_tiling(batch, tb_cap):
    """Pick (tb, n_tiles): tb multiple of 8, n_tiles even >= 2 when possible."""
    if batch <= 8:
        return _round_up(max(batch, 1), 8), 1
    # Even tile count so the 'parallel' batch axis shards over both v7x TCs.
    n_tiles = 2 * pl.cdiv(batch, 2 * tb_cap)
    tb = _round_up(pl.cdiv(batch, n_tiles), 8)
    return tb, n_tiles


def encoder_forward(x, kernel_params, *, tb_cap=1024, stream_dtype=jnp.bfloat16):
    """Runs the Pallas encoder. Returns (mu, variance, out) like the PyTorch module."""
    w1, b1, w2, b2, w3, b3, s3, t3 = kernel_params
    B, d_in = x.shape
    d_out = w3.shape[1]              # == 2 * zdim
    zdim = d_out // 2

    tb, n_tiles = _choose_tiling(B, tb_cap)
    b_pad = tb * n_tiles
    if b_pad != B:
        x = jnp.pad(x, ((0, b_pad - B), (0, 0)))

    # Stream the big operands (x, weights) in bf16; keep affine terms in f32.
    x = x.astype(stream_dtype)
    w1s = w1.astype(stream_dtype)
    w2s = w2.astype(stream_dtype)
    w3s = w3.astype(stream_dtype)

    def resident(shape):
        # Full-array block that stays in VMEM across all batch tiles.
        return pl.BlockSpec(shape, lambda i: (0, 0))

    grid_spec = pltpu.PrefetchScalarGridSpec(
        num_scalar_prefetch=0,
        grid=(n_tiles,),
        in_specs=[
            pl.BlockSpec((tb, d_in), lambda i: (i, 0)),    # x: streamed over batch
            resident(w1s.shape), resident(b1.shape),
            resident(w2s.shape), resident(b2.shape),
            resident(w3s.shape), resident(b3.shape),
            resident(s3.shape), resident(t3.shape),
        ],
        out_specs=pl.BlockSpec((tb, d_out), lambda i: (i, 0)),
    )

    h1, h2 = w1.shape[1], w2.shape[1]
    flops = 2 * b_pad * (d_in * h1 + h1 * h2 + h2 * d_out)
    isz = jnp.dtype(stream_dtype).itemsize
    bytes_accessed = (isz * (b_pad * d_in + w1.size + w2.size + w3.size)
                      + 4 * (b_pad * d_out + b1.size + b2.size + b3.size
                             + s3.size + t3.size))

    out = pl.pallas_call(
        encoder_kernel,
        out_shape=jax.ShapeDtypeStruct((b_pad, d_out), jnp.float32),
        grid_spec=grid_spec,
        compiler_params=pltpu.CompilerParams(
            dimension_semantics=("parallel",)),
        cost_estimate=pl.CostEstimate(
            flops=flops, transcendentals=0, bytes_accessed=bytes_accessed),
    )(x, w1s, b1, w2s, b2, w3s, b3, s3, t3)

    out = out[:B]
    # chunk(2, dim=1): free HBM-level slices (kept out of the kernel so the
    # kernel's only output is a single dense slab).
    mu = out[:, :zdim]
    var = out[:, zdim:]
    return mu, var, out


# ----------------------------------------------------------------------------
# Parameter construction / preparation
# ----------------------------------------------------------------------------

def init_params(key, input_size, encoder_dims):
    """Raw per-layer params (w, b, bn_scale, bn_shift), PyTorch-default-like init.

    w is (in_features, out_features); bn_scale/bn_shift are the folded eval-mode
    BatchNorm1d terms: scale = gamma / sqrt(running_var + eps),
    shift = beta - running_mean * scale.
    """
    params = []
    current = input_size
    zdim = encoder_dims[-1]
    for hdim in encoder_dims:
        out_dim = 2 * hdim if hdim == zdim else hdim
        key, kw, kb, kg, kbe, km, kv = jax.random.split(key, 7)
        bound = 1.0 / jnp.sqrt(jnp.float32(current))
        w = jax.random.uniform(kw, (current, out_dim), jnp.float32, -bound, bound)
        b = jax.random.uniform(kb, (out_dim,), jnp.float32, -bound, bound)
        gamma = jax.random.uniform(kg, (out_dim,), jnp.float32, 0.5, 1.5)
        beta = jax.random.uniform(kbe, (out_dim,), jnp.float32, -0.1, 0.1)
        rmean = jax.random.uniform(km, (out_dim,), jnp.float32, -0.5, 0.5)
        rvar = jax.random.uniform(kv, (out_dim,), jnp.float32, 0.5, 1.5)
        scale = gamma / jnp.sqrt(rvar + BN_EPS)
        shift = beta - rmean * scale
        params.append((w, b, scale, shift))
        current = hdim
    return params


def prepare_kernel_params(raw_params):
    """Fold BN of layers 1 and 2 into the following layer's weights/bias.

    layer_l output = s_l * leaky(y_l) + t_l, which feeds Linear_{l+1}:
        (s*a + t) @ W + b  ==  a @ (diag(s) W) + (t @ W + b)
    so only the final layer's BN remains explicit (s3 / t3).
    """
    (w1, b1, s1, t1), (w2, b2, s2, t2), (w3, b3, s3, t3) = raw_params
    w2f = s1[:, None] * w2
    b2f = b2 + t1 @ w2
    w3f = s2[:, None] * w3
    b3f = b3 + t2 @ w3
    return (w1, b1[None, :], w2f, b2f[None, :], w3f,
            b3f[None, :], s3[None, :], t3[None, :])


def encoder_reference(x, raw_params):
    """Pure-JAX reference using the unfused per-layer math (all f32)."""
    out = x
    for w, b, s, t in raw_params:
        y = out @ w + b
        y = jnp.where(y > 0, y, RALPHA * y)
        out = y * s + t
    zdim = out.shape[-1] // 2
    return out[:, :zdim], out[:, zdim:], out


if __name__ == "__main__":
    input_size = 256
    encoder_dims = [128, 64, 32]     # zdim = 32, final layer width = 2*32 = 64

    key = jax.random.PRNGKey(0)
    kx, kp = jax.random.split(key)
    raw_params = init_params(kp, input_size, encoder_dims)
    kernel_params = prepare_kernel_params(raw_params)

    ok = True
    # 512: exact even tiles; 200: exercises pad path; 16: tiny two-tile case.
    for batch in (512, 200, 16):
        x = jax.random.normal(jax.random.fold_in(kx, batch),
                              (batch, input_size), dtype=jnp.float32)
        mu_r, var_r, out_r = encoder_reference(x, raw_params)

        # f32-streaming path: validates the BN-folding algebra exactly.
        mu, var, out = encoder_forward(x, kernel_params, stream_dtype=jnp.float32)
        jax.block_until_ready((mu, var, out))
        ok &= bool(jnp.allclose(mu, mu_r, atol=1e-3, rtol=1e-3))
        ok &= bool(jnp.allclose(var, var_r, atol=1e-3, rtol=1e-3))
        ok &= bool(jnp.allclose(out, out_r, atol=1e-3, rtol=1e-3))

        # bf16-streaming path (the performance configuration): looser tolerance
        # covers the deliberate bf16 rounding of x / weights.
        fwd = functools.partial(encoder_forward, stream_dtype=jnp.bfloat16)
        mu, var, out = fwd(x, kernel_params)
        jax.block_until_ready((mu, var, out))
        ok &= bool(jnp.allclose(mu, mu_r, atol=5e-2, rtol=5e-2))
        ok &= bool(jnp.allclose(var, var_r, atol=5e-2, rtol=5e-2))
        ok &= bool(jnp.allclose(out, out_r, atol=5e-2, rtol=5e-2))

    assert ok, "Pallas encoder output mismatch vs reference"
    print("KERNEL_OK")
</pallas_src>

<mosaic_0001>
module attributes {stable_mosaic.version = 11 : i64} {
  func.func @encoder_kernel(%arg0: i32, %arg1: memref<256x256xf32, #tpu.memory_space<vmem>>, %arg2: memref<256x128xf32, #tpu.memory_space<vmem>>, %arg3: memref<1x128xf32, #tpu.memory_space<vmem>>, %arg4: memref<128x64xf32, #tpu.memory_space<vmem>>, %arg5: memref<1x64xf32, #tpu.memory_space<vmem>>, %arg6: memref<64x64xf32, #tpu.memory_space<vmem>>, %arg7: memref<1x64xf32, #tpu.memory_space<vmem>>, %arg8: memref<1x64xf32, #tpu.memory_space<vmem>>, %arg9: memref<1x64xf32, #tpu.memory_space<vmem>>, %arg10: memref<256x64xf32, #tpu.memory_space<vmem>>) attributes {dimension_semantics = [#tpu.dimension_semantics<parallel>], iteration_bounds = array<i64: 2>, scalar_prefetch = 0 : i64, scratch_operands = 0 : i64, tpu.core_type = #tpu.core_type<tc>, window_params = [{transform_indices = @transform_0, window_bounds = array<i64: 256, 256>}, {pipeline_mode = #tpu.pipeline_mode<synchronous>, transform_indices = @transform_1, window_bounds = array<i64: 256, 128>}, {pipeline_mode = #tpu.pipeline_mode<synchronous>, transform_indices = @transform_2, window_bounds = array<i64: 1, 128>}, {pipeline_mode = #tpu.pipeline_mode<synchronous>, transform_indices = @transform_3, window_bounds = array<i64: 128, 64>}, {pipeline_mode = #tpu.pipeline_mode<synchronous>, transform_indices = @transform_4, window_bounds = array<i64: 1, 64>}, {pipeline_mode = #tpu.pipeline_mode<synchronous>, transform_indices = @transform_5, window_bounds = array<i64: 64, 64>}, {pipeline_mode = #tpu.pipeline_mode<synchronous>, transform_indices = @transform_6, window_bounds = array<i64: 1, 64>}, {pipeline_mode = #tpu.pipeline_mode<synchronous>, transform_indices = @transform_7, window_bounds = array<i64: 1, 64>}, {pipeline_mode = #tpu.pipeline_mode<synchronous>, transform_indices = @transform_8, window_bounds = array<i64: 1, 64>}, {transform_indices = @transform_9, window_bounds = array<i64: 256, 64>}]} {
    %c0 = arith.constant 0 : index
    %c0_0 = arith.constant 0 : index
    %0 = vector.load %arg1[%c0, %c0_0] : memref<256x256xf32, #tpu.memory_space<vmem>>, vector<256x256xf32>
    %c0_1 = arith.constant 0 : index
    %c0_2 = arith.constant 0 : index
    %1 = vector.load %arg2[%c0_1, %c0_2] : memref<256x128xf32, #tpu.memory_space<vmem>>, vector<256x128xf32>
    %cst = arith.constant dense<0.000000e+00> : vector<256x128xf32>
    %2 = tpu.matmul %0, %1, %cst {dimension_numbers = #tpu.dot_dimension_numbers<[1], [0], [0], [1], [0, 0, 1, 1], [], []>} : vector<256x256xf32>, vector<256x128xf32>, vector<256x128xf32> -> vector<256x128xf32>
    %c0_3 = arith.constant 0 : index
    %c0_4 = arith.constant 0 : index
    %3 = vector.load %arg3[%c0_3, %c0_4] : memref<1x128xf32, #tpu.memory_space<vmem>>, vector<1x128xf32>
    %4 = vector.broadcast %3 : vector<1x128xf32> to vector<256x128xf32>
    %5 = arith.addf %2, %4 : vector<256x128xf32>
    %cst_5 = arith.constant 0.000000e+00 : f32
    %6 = vector.broadcast %cst_5 : f32 to vector<256x128xf32>
    %7 = arith.cmpf ogt, %5, %6 : vector<256x128xf32>
    %cst_6 = arith.constant 2.000000e-01 : f32
    %8 = vector.broadcast %cst_6 : f32 to vector<256x128xf32>
    %9 = arith.mulf %8, %5 : vector<256x128xf32>
    %10 = arith.select %7, %5, %9 : vector<256x128xi1>, vector<256x128xf32>
    %c0_7 = arith.constant 0 : index
    %c0_8 = arith.constant 0 : index
    %11 = vector.load %arg4[%c0_7, %c0_8] : memref<128x64xf32, #tpu.memory_space<vmem>>, vector<128x64xf32>
    %cst_9 = arith.constant dense<0.000000e+00> : vector<256x64xf32>
    %12 = tpu.matmul %10, %11, %cst_9 {dimension_numbers = #tpu.dot_dimension_numbers<[1], [0], [0], [1], [0, 0, 1, 1], [], []>} : vector<256x128xf32>, vector<128x64xf32>, vector<256x64xf32> -> vector<256x64xf32>
    %c0_10 = arith.constant 0 : index
    %c0_11 = arith.constant 0 : index
    %13 = vector.load %arg5[%c0_10, %c0_11] : memref<1x64xf32, #tpu.memory_space<vmem>>, vector<1x64xf32>
    %14 = vector.broadcast %13 : vector<1x64xf32> to vector<256x64xf32>
    %15 = arith.addf %12, %14 : vector<256x64xf32>
    %cst_12 = arith.constant 0.000000e+00 : f32
    %16 = vector.broadcast %cst_12 : f32 to vector<256x64xf32>
    %17 = arith.cmpf ogt, %15, %16 : vector<256x64xf32>
    %cst_13 = arith.constant 2.000000e-01 : f32
    %18 = vector.broadcast %cst_13 : f32 to vector<256x64xf32>
    %19 = arith.mulf %18, %15 : vector<256x64xf32>
    %20 = arith.select %17, %15, %19 : vector<256x64xi1>, vector<256x64xf32>
    %c0_14 = arith.constant 0 : index
    %c0_15 = arith.constant 0 : index
    %21 = vector.load %arg6[%c0_14, %c0_15] : memref<64x64xf32, #tpu.memory_space<vmem>>, vector<64x64xf32>
    %cst_16 = arith.constant dense<0.000000e+00> : vector<256x64xf32>
    %22 = tpu.matmul %20, %21, %cst_16 {dimension_numbers = #tpu.dot_dimension_numbers<[1], [0], [0], [1], [0, 0, 1, 1], [], []>} : vector<256x64xf32>, vector<64x64xf32>, vector<256x64xf32> -> vector<256x64xf32>
    %c0_17 = arith.constant 0 : index
    %c0_18 = arith.constant 0 : index
    %23 = vector.load %arg7[%c0_17, %c0_18] : memref<1x64xf32, #tpu.memory_space<vmem>>, vector<1x64xf32>
    %24 = vector.broadcast %23 : vector<1x64xf32> to vector<256x64xf32>
    %25 = arith.addf %22, %24 : vector<256x64xf32>
    %cst_19 = arith.constant 0.000000e+00 : f32
    %26 = vector.broadcast %cst_19 : f32 to vector<256x64xf32>
    %27 = arith.cmpf ogt, %25, %26 : vector<256x64xf32>
    %cst_20 = arith.constant 2.000000e-01 : f32
    %28 = vector.broadcast %cst_20 : f32 to vector<256x64xf32>
    %29 = arith.mulf %28, %25 : vector<256x64xf32>
    %30 = arith.select %27, %25, %29 : vector<256x64xi1>, vector<256x64xf32>
    %c0_21 = arith.constant 0 : index
    %c0_22 = arith.constant 0 : index
    %31 = vector.load %arg8[%c0_21, %c0_22] : memref<1x64xf32, #tpu.memory_space<vmem>>, vector<1x64xf32>
    %32 = vector.broadcast %31 : vector<1x64xf32> to vector<256x64xf32>
    %33 = arith.mulf %30, %32 : vector<256x64xf32>
    %c0_23 = arith.constant 0 : index
    %c0_24 = arith.constant 0 : index
    %34 = vector.load %arg9[%c0_23, %c0_24] : memref<1x64xf32, #tpu.memory_space<vmem>>, vector<1x64xf32>
    %35 = vector.broadcast %34 : vector<1x64xf32> to vector<256x64xf32>
    %36 = arith.addf %33, %35 : vector<256x64xf32>
    %c0_25 = arith.constant 0 : index
    %c0_26 = arith.constant 0 : index
    %37 = vector.load %arg10[%c0_25, %c0_26] : memref<256x64xf32, #tpu.memory_space<vmem>>, vector<256x64xf32>
    tpu.vector_store %arg10[%c0_25, %c0_26], %36 {strides = array<i32>} : memref<256x64xf32, #tpu.memory_space<vmem>>, vector<256x64xf32>,
    return
  }
  func.func @transform_0(%arg0: i32) -> (i32, i32) {
    %c0_i32 = arith.constant 0 : i32
    %c0_i32_0 = arith.constant 0 : i32
    return %arg0, %c0_i32 : i32, i32
  }
  func.func @transform_1(%arg0: i32) -> (i32, i32) {
    %c0_i32 = arith.constant 0 : i32
    %c0_i32_0 = arith.constant 0 : i32
    %c0_i32_1 = arith.constant 0 : i32
    return %c0_i32, %c0_i32_0 : i32, i32
  }
  func.func @transform_2(%arg0: i32) -> (i32, i32) {
    %c0_i32 = arith.constant 0 : i32
    %c0_i32_0 = arith.constant 0 : i32
    %c0_i32_1 = arith.constant 0 : i32
    return %c0_i32, %c0_i32_0 : i32, i32
  }
  func.func @transform_3(%arg0: i32) -> (i32, i32) {
    %c0_i32 = arith.constant 0 : i32
    %c0_i32_0 = arith.constant 0 : i32
    %c0_i32_1 = arith.constant 0 : i32
    return %c0_i32, %c0_i32_0 : i32, i32
  }
  func.func @transform_4(%arg0: i32) -> (i32, i32) {
    %c0_i32 = arith.constant 0 : i32
    %c0_i32_0 = arith.constant 0 : i32
    %c0_i32_1 = arith.constant 0 : i32
    return %c0_i32, %c0_i32_0 : i32, i32
  }
  func.func @transform_5(%arg0: i32) -> (i32, i32) {
    %c0_i32 = arith.constant 0 : i32
    %c0_i32_0 = arith.constant 0 : i32
    %c0_i32_1 = arith.constant 0 : i32
    return %c0_i32, %c0_i32_0 : i32, i32
  }
  func.func @transform_6(%arg0: i32) -> (i32, i32) {
    %c0_i32 = arith.constant 0 : i32
    %c0_i32_0 = arith.constant 0 : i32
    %c0_i32_1 = arith.constant 0 : i32
    return %c0_i32, %c0_i32_0 : i32, i32
  }
  func.func @transform_7(%arg0: i32) -> (i32, i32) {
    %c0_i32 = arith.constant 0 : i32
    %c0_i32_0 = arith.constant 0 : i32
    %c0_i32_1 = arith.constant 0 : i32
    return %c0_i32, %c0_i32_0 : i32, i32
  }
  func.func @transform_8(%arg0: i32) -> (i32, i32) {
    %c0_i32 = arith.constant 0 : i32
    %c0_i32_0 = arith.constant 0 : i32
    %c0_i32_1 = arith.constant 0 : i32
    return %c0_i32, %c0_i32_0 : i32, i32
  }
  func.func @transform_9(%arg0: i32) -> (i32, i32) {
    %c0_i32 = arith.constant 0 : i32
    %c0_i32_0 = arith.constant 0 : i32
    return %arg0, %c0_i32 : i32, i32
  }
}

</mosaic_0001>

<bundles_post_ra>
// kernel: tpu_custom_call.1
= control target key start
LH: loop header
LB: loop body
LE: loop exit
PB: predicated region body
PF: predicated region fallthrough
CT: control target
= control target key end

     0   :  { %14 = vsyncpa [#allocation3], 0  ;;  %s2834_s0 = inlined_call_operand.hbm [shape: f32[512,256], index: 0, kind: input, shape index: {}]   ;;  %s2835_s1 = inlined_call_operand.hbm [shape: f32[256,128], index: 1, kind: input, shape index: {}]   ;;  %s2836_s2 = inlined_call_operand.vmem [shape: f32[1,128], index: 2, kind: input, shape index: {}]   ;;  %s2837_s3 = inlined_call_operand.vmem [shape: f32[128,64], index: 3, kind: input, shape index: {}]   ;;  %s2838_s4 = inlined_call_operand.vmem [shape: f32[1,64], index: 4, kind: input, shape index: {}]   ;;  %s2839_s5 = inlined_call_operand.vmem [shape: f32[64,64], index: 5, kind: input, shape index: {}]   ;;  %s2840_s6 = inlined_call_operand.vmem [shape: f32[1,64], index: 6, kind: input, shape index: {}]   ;;  %s2841_s7 = inlined_call_operand.vmem [shape: f32[1,64], index: 7, kind: input, shape index: {}]   ;;  %s2842_s8 = inlined_call_operand.vmem [shape: f32[1,64], index: 8, kind: input, shape index: {}]   ;;  %s2843_s9 = inlined_call_operand.vmem [shape: f32[512,64], index: 9, kind: output, shape index: {}]  }
   0x1   :  { %16 = vsyncpa [#allocation3 + $0x1], 0 }
   0x2   :  { %17 = vsyncpa [#allocation5], 0  ;;  %s2252_s30 = smov 0   ;;  %s2254_s10 = smov 0  }
   0x3   :  { %s2256_s11 = smov 0   ;;  %s2258_s12 = smov 0  }
   0x4 LB: > { %s2844_s13 = sadd.s32 4294967295, %s2193_s12   ;;  %p43_p0 = scmp.ne.s32.totalorder %s2185_s10, %s2181_s30  ;;  %s2193_s12 = sphi %s2258_s12, %s2861_s12   ;;  %s2189_s11 = sphi %s2256_s11, %s2864_s11   ;;  %s2185_s10 = sphi %s2254_s10, %s2863_s10   ;;  %s2181_s30 = sphi %s2252_s30, %s2862_s30  }
   0x5   : > { %p2274_p1 = scmp.eq.s32.totalorder %s2844_s13, 0  ;;  %p1761_p2 = scmp.ge.s32.totalorder %s2193_s12, 1 }
   0x6   : > { %p248_p3 = scmp.lt.s32.totalorder %s2193_s12, 3  ;;  %s2195_s17 = smov [#allocation4]  }
   0x7   : > { %s2851_s14 = scalar_select %p2274_p1, 1, 0 }
   0x8   : > { %p2282_p4 = por %p2274_p1, %p43_p0  ;;  %p2286_p5 = pnand %p1761_p2, %p248_p3 }
   0x9   : > { %s260_s18 = sshll.u32 %s2195_s17, 4  ;;  %s2299_s20 = sadd.s32 1, %s2193_s12   ;;  %s261_s18 = int_to_ptr.vmem [resolvable:$true] %s260_s18 }
   0xa   : > { %s2852_s15 = scalar_select %p2282_p4, 1, 0 }
   0xb   : > { %s2853_s16 = scalar_select %p2286_p5, 1, 0 }
   0xc   : > { %p2052_p6 = pneg %p2286_p5  ;;  %2855 = sst [smem:[#allocation8_spill]] %s2299_s20 }
   0xd   : > { %s30_s21 = sadd.s32 1, %s2189_s11  ;;  %s27_s22 = ssub.s32 %s2193_s12, %s2299_s20 }
   0xe   : > { %p2294_p7 = pnand %p2052_p6, %p2274_p1  ;;  %s2112_s23 = scalar_lea.vmem %s261_s18, 4096 }
   0xf   : > { %p2113_p9 = scmp.ne.s32.totalorder %s261_s18, %s2112_s23  ;;  %p2120_p12 = scmp.lt.s32.totalorder %s261_s18, %s261_s18 }
  0x10   : > { %p2103_p8 = pneg %p2294_p7  ;;  %p2121_p13 = scmp.lt.s32.totalorder %s2112_s23, %s2112_s23 }
  0x12   : > { %p2115_p10 = pnand %p2113_p9, %p2103_p8  ;;  %p2122_p0 = por %p2121_p13, %p2120_p12 }
  0x14   : > { %p2116_p11 = pneg %p2115_p10 }
  0x16   : > { %p2123_p2 = pnand %p2122_p0, %p2116_p11 }
  0x18   : > { %2126 = shalt.err (!%p2123_p2)
}
  0x19   : > { %s2196_s24 = smov 128   ;;  %s2197_s25 = smov 8  }
  0x1a   : > { %2055 = dma.hbm_to_vmem [thread:$0]  (!%p2294_p7), %s2835_s1, 4096, %s261_s18, [#allocation5], %s2196_s24, %s2196_s24, %s2197_s25  }
  0x1b   : > { %p28_p3 = scmp.eq.s32.totalorder %s27_s22, 0  ;;  %p37_p6 = scmp.ne.s32.totalorder %s2189_s11, %s2185_s10 }
  0x1c   : > { %p38_p8 = scmp.eq.s32.totalorder %s2193_s12, 0  ;;  %p2061_p9 = scmp.lt.s32.totalorder %s2193_s12, 2 }
  0x1d   : > { %s2316_s28 = scalar_select %p28_p3, %s2189_s11, %s30_s21  }
  0x1e   : > { %p39_p10 = por %p38_p8, %p37_p6  ;;  %s295_s29 = sand.u32 1, %s2189_s11  }
  0x1f   : > { %s1764_s30 = sshll.u32 %s295_s29, 9  ;;  %s1813_s17 = sshll.u32 %s2193_s12, 13 }
  0x20   : > { %s2323_s20 = scalar_lea.hbm %s2834_s0, %s1813_s17  ;;  %s299_s19 = scalar_lea.vmem [#allocation2], %s1764_s30 }
  0x21   : > { %s307_s18 = sshll.u32 %s299_s19, 4  ;;  %p2327_p7 = pnand %p2061_p9, %p39_p10  ;;  %s2325_s18 = int_to_ptr.vmem [resolvable:$true] %s307_s18 }
  0x22   : > { %s2331_s21 = scalar_lea.sflag [#allocation3], %s295_s29  ;;  %s2127_s24 = scalar_lea.hbm %s2323_s20, 8192 }
  0x23   : > { %p2128_p11 = scmp.ne.s32.totalorder %s2323_s20, %s2127_s24  ;;  %p2129_p12 = pneg %p2327_p7 }
  0x24   : > { %s2132_s26 = scalar_lea.hbm %s2834_s0, 16384  ;;  %p2133_p2 = scmp.lt.s32.totalorder %s2323_s20, %s2834_s0 }
  0x25   : > { %p2130_p13 = pnand %p2129_p12, %p2128_p11  ;;  %p2134_p3 = scmp.lt.s32.totalorder %s2132_s26, %s2127_s24 }
  0x27   : > { %p2131_p0 = pneg %p2130_p13  ;;  %p2135_p6 = por %p2134_p3, %p2133_p2 }
  0x29   : > { %p2136_p8 = pnand %p2135_p6, %p2131_p0 }
  0x2b   : > { %2139 = shalt.err (!%p2136_p8)
}
  0x2c   : > { %s2140_s29 = scalar_lea.vmem %s2325_s18, 8192  ;;  %s2198_s17 = smov [#allocation2]  }
  0x2d   : > { %p2141_p9 = scmp.ne.s32.totalorder %s2325_s18, %s2140_s29  ;;  %s2145_s23 = sshll.u32 %s2198_s17, 4  ;;  %s2146_s23 = int_to_ptr.vmem [resolvable:$false] %s2145_s23 }
  0x2e   : > { %s2147_s19 = scalar_lea.vmem %s2146_s23, 16384  ;;  %p2148_p13 = scmp.lt.s32.totalorder %s2325_s18, %s2146_s23 }
  0x2f   : > { %p2143_p10 = pnand %p2141_p9, %p2129_p12  ;;  %p2149_p1 = scmp.lt.s32.totalorder %s2147_s19, %s2140_s29 }
  0x31   : > { %p2144_p11 = pneg %p2143_p10  ;;  %p2150_p4 = por %p2149_p1, %p2148_p13 }
  0x33   : > { %p2151_p5 = pnand %p2150_p4, %p2144_p11 }
  0x35   : > { %2154 = shalt.err (!%p2151_p5)
}
  0x36   : > { %s2199_s24 = smov 256   ;;  %s2200_s13 = smov 16  }
  0x37   : > { %2059 = dma.hbm_to_vmem [thread:$0]  (!%p2327_p7), %s2323_s20, 8192, %s2325_s18, %s2331_s21, %s2199_s24, %s2199_s24, %s2200_s13  }
  0x38   : > { %p2857_p12 = scmp.ne.s32.totalorder %s2853_s16, 0 }
  0x39   : > { %s321_s25 = sand.u32 (!%p2857_p12), 1, %s2185_s10   ;;  %p2858_p1 = scmp.ne.s32.totalorder (!%p2857_p12), %s2852_s15, 0 }
  0x3a   : > { %319 = sbr.rel (%p2857_p12) target bundleno = 860 (0x35c), region = 56  ;;  %s1769_s26 = sshll.u32 (!%p2857_p12), %s321_s25, 9 }
  0x3b   : > { %s322_s27 = scalar_lea.sflag (!%p2857_p12), [#allocation3], %s321_s25  ;;  %s2355_s30 = scalar_lea.vmem (!%p2857_p12), [#allocation2], %s1769_s26 }
  0x3f   : > { %2172 = dma.done.wait (%p2858_p1), %s322_s27, 8192  }
  0x40   : > { %2174 = vsyncadd (%p2858_p1), %s322_s27, 4294959104  ;;  %p2859_p4 = scmp.ne.s32.totalorder %s2851_s14, 0 }
  0x42   : > { %2176 = dma.done.wait (%p2859_p4), [#allocation5], 4096  }
  0x43   : > { %2178 = vsyncadd (%p2859_p4), [#allocation5], 4294963200  ;;  %v2201_v0 = vmov 0.0   ;;  %v450_v1 = vld [vmem:[#allocation4 + $0x78] sm:$0xff]  ;;  %v449_v2 = vld [vmem:[#allocation4 + $0x70] sm:$0xff]  ;;  %s2860_s20 = sadd.s32 4294967295, %s2193_s12  }
  0x44   : > { %474 = vmatprep.subr.mxu0 %v2201_v0  ;;  %v448_v3 = vld [vmem:[#allocation4 + $0x68] sm:$0xff]  ;;  %v447_v4 = vld [vmem:[#allocation4 + $0x60] sm:$0xff]  ;;  %v446_v5 = vld [vmem:[#allocation4 + $0x58] sm:$0xff] }
  0x45   : > { %475 = vmatpush1.msra.mxu0 %v450_v1  ;;  %v445_v6 = vld [vmem:[#allocation4 + $0x50] sm:$0xff]  ;;  %v444_v7 = vld [vmem:[#allocation4 + $0x48] sm:$0xff]  ;;  %v443_v9 = vld [vmem:[#allocation4 + $0x40] sm:$0xff] }
  0x46   : > { %476 = vmatprep.subr.mxu0 %v2201_v0  ;;  %v372_v8 = vld [vmem:[%s2355_s30 + $0x8] sm:$0xff]  ;;  %v442_v10 = vld [vmem:[#allocation4 + $0x38] sm:$0xff]  ;;  %v441_v11 = vld [vmem:[#allocation4 + $0x30] sm:$0xff] }
  0x47   : > { %477 = vmatpush1.msra.mxu0 %v449_v2  ;;  %538 = vmatprep.mubr.f32.mxu0 %v372_v8  ;;  %v440_v12 = vld [vmem:[#allocation4 + $0x28] sm:$0xff]  ;;  %v439_v13 = vld [vmem:[#allocation4 + $0x20] sm:$0xff]  ;;  %v438_v14 = vld [vmem:[#allocation4 + $0x18] sm:$0xff] }
  0x48   : > { %478 = vmatprep.subr.mxu0 %v2201_v0  ;;  %v437_v15 = vld [vmem:[#allocation4 + $0x10] sm:$0xff]  ;;  %v436_v16 = vld [vmem:[#allocation4 + $0x8] sm:$0xff]  ;;  %v435_v17 = vld [vmem:[#allocation4] sm:$0xff] }
  0x49   : > { %479 = vmatpush1.msra.mxu0 %v448_v3  ;;  %v466_v18 = vld [vmem:[#allocation4 + $0xf8] sm:$0xff]  ;;  %v465_v19 = vld [vmem:[#allocation4 + $0xf0] sm:$0xff]  ;;  %v464_v20 = vld [vmem:[#allocation4 + $0xe8] sm:$0xff] }
  0x4a   : > { %480 = vmatprep.subr.mxu0 %v2201_v0  ;;  %v463_v21 = vld [vmem:[#allocation4 + $0xe0] sm:$0xff]  ;;  %v462_v22 = vld [vmem:[#allocation4 + $0xd8] sm:$0xff]  ;;  %v461_v23 = vld [vmem:[#allocation4 + $0xd0] sm:$0xff] }
  0x4b   : > { %481 = vmatpush1.msra.mxu0 %v447_v4  ;;  %v460_v24 = vld [vmem:[#allocation4 + $0xc8] sm:$0xff]  ;;  %v459_v25 = vld [vmem:[#allocation4 + $0xc0] sm:$0xff]  ;;  %v458_v26 = vld [vmem:[#allocation4 + $0xb8] sm:$0xff] }
  0x4c   : > { %482 = vmatprep.subr.mxu0 %v2201_v0  ;;  %v457_v27 = vld [vmem:[#allocation4 + $0xb0] sm:$0xff]  ;;  %v456_v28 = vld [vmem:[#allocation4 + $0xa8] sm:$0xff]  ;;  %v455_v29 = vld [vmem:[#allocation4 + $0xa0] sm:$0xff] }
  0x4d   : > { %483 = vmatpush1.msra.mxu0 %v446_v5  ;;  %v454_v30 = vld [vmem:[#allocation4 + $0x98] sm:$0xff]  ;;  %v453_v31 = vld [vmem:[#allocation4 + $0x90] sm:$0xff]  ;;  %v452_v32 = vld [vmem:[#allocation4 + $0x88] sm:$0xff] }
  0x4e   : > { %484 = vmatprep.subr.mxu0 %v2201_v0  ;;  %v451_v33 = vld [vmem:[#allocation4 + $0x80] sm:$0xff]  ;;  %v810_v34 = vld [vmem:[%s2837_s3 + $0x78] sm:$0xff]  ;;  %v809_v35 = vld [vmem:[%s2837_s3 + $0x70] sm:$0xff] }
  0x4f   : > { %485 = vmatpush1.msra.mxu0 %v445_v6  ;;  %v371_v36 = vld [vmem:[%s2355_s30] sm:$0xff]  ;;  %1902 = vmatprep.subr.mxu1 %v810_v34  ;;  %v374_v37 = vld [vmem:[%s2355_s30 + $0x18] sm:$0xff]  ;;  %v808_v38 = vld [vmem:[%s2837_s3 + $0x68] sm:$0xff] }
  0x50   : > { %486 = vmatprep.subr.mxu0 %v2201_v0  ;;  %1903 = vmatpush3.msra.mxu1 %v810_v34  ;;  %v807_v39 = vld [vmem:[%s2837_s3 + $0x60] sm:$0xff]  ;;  %v373_v40 = vld [vmem:[%s2355_s30 + $0x10] sm:$0xff]  ;;  %v376_v41 = vld [vmem:[%s2355_s30 + $0x28] sm:$0xff] }
  0x51   : > { %487 = vmatpush1.msra.mxu0 %v444_v7  ;;  %1904 = vmatprep.subr.mxu1 %v809_v35  ;;  %v806_v42 = vld [vmem:[%s2837_s3 + $0x58] sm:$0xff]  ;;  %v805_v43 = vld [vmem:[%s2837_s3 + $0x50] sm:$0xff]  ;;  %v375_v44 = vld [vmem:[%s2355_s30 + $0x20] sm:$0xff] }
  0x52   : > { %488 = vmatprep.subr.mxu0 %v2201_v0  ;;  %1905 = vmatpush3.msra.mxu1 %v809_v35  ;;  %v378_v45 = vld [vmem:[%s2355_s30 + $0x38] sm:$0xff]  ;;  %v804_v46 = vld [vmem:[%s2837_s3 + $0x48] sm:$0xff]  ;;  %v803_v47 = vld [vmem:[%s2837_s3 + $0x40] sm:$0xff] }
  0x53   : > { %489 = vmatpush1.msra.mxu0 %v443_v9  ;;  %1906 = vmatprep.subr.mxu1 %v808_v38  ;;  %v377_v48 = vld [vmem:[%s2355_s30 + $0x30] sm:$0xff]  ;;  %v380_v49 = vld [vmem:[%s2355_s30 + $0x48] sm:$0xff]  ;;  %v802_v50 = vld [vmem:[%s2837_s3 + $0x38] sm:$0xff] }
  0x54   : > { %490 = vmatprep.subr.mxu0 %v2201_v0  ;;  %1907 = vmatpush3.msra.mxu1 %v808_v38  ;;  %v801_v51 = vld [vmem:[%s2837_s3 + $0x30] sm:$0xff]  ;;  %v379_v52 = vld [vmem:[%s2355_s30 + $0x40] sm:$0xff]  ;;  %v382_v53 = vld [vmem:[%s2355_s30 + $0x58] sm:$0xff] }
  0x55   : > { %491 = vmatpush1.msra.mxu0 %v442_v10  ;;  %1908 = vmatprep.subr.mxu1 %v807_v39  ;;  %v800_v54 = vld [vmem:[%s2837_s3 + $0x28] sm:$0xff]  ;;  %v381_v55 = vld [vmem:[%s2355_s30 + $0x50] sm:$0xff]  ;;  %v383_v57 = vld [vmem:[%s2355_s30 + $0x60] sm:$0xff] }
  0x56   : > { %492 = vmatprep.subr.mxu0 %v2201_v0  ;;  %1909 = vmatpush3.msra.mxu1 %v807_v39  ;;  %v384_v56 = vld [vmem:[%s2355_s30 + $0x68] sm:$0xff]  ;;  %v386_v58 = vld [vmem:[%s2355_s30 + $0x78] sm:$0xff]  ;;  %v385_v59 = vld [vmem:[%s2355_s30 + $0x70] sm:$0xff] }
  0x57   : > { %493 = vmatpush1.msra.mxu0 %v441_v11  ;;  %1910 = vmatprep.subr.mxu1 %v806_v42  ;;  %v388_v60 = vld [vmem:[%s2355_s30 + $0x88] sm:$0xff]  ;;  %v387_v61 = vld [vmem:[%s2355_s30 + $0x80] sm:$0xff]  ;;  %v390_v62 = vld [vmem:[%s2355_s30 + $0x98] sm:$0xff] }
  0x58   : > { %494 = vmatprep.subr.mxu0 %v2201_v0  ;;  %1911 = vmatpush3.msra.mxu1 %v806_v42  ;;  %v389_v63 = vld [vmem:[%s2355_s30 + $0x90] sm:$0xff]  ;;  %v391_v1 = vld [vmem:[%s2355_s30 + $0xa0] sm:$0xff]  ;;  %v394_v2 = vld [vmem:[%s2355_s30 + $0xb8] sm:$0xff] }
  0x59   : > { %495 = vmatpush1.msra.mxu0 %v440_v12  ;;  %1912 = vmatprep.subr.mxu1 %v805_v43  ;;  %v393_v3 = vld [vmem:[%s2355_s30 + $0xb0] sm:$0xff]  ;;  %v396_v4 = vld [vmem:[%s2355_s30 + $0xc8] sm:$0xff]  ;;  %v395_v5 = vld [vmem:[%s2355_s30 + $0xc0] sm:$0xff] }
  0x5a   : > { %496 = vmatprep.subr.mxu0 %v2201_v0  ;;  %1913 = vmatpush3.msra.mxu1 %v805_v43  ;;  %v398_v6 = vld [vmem:[%s2355_s30 + $0xd8] sm:$0xff]  ;;  %v397_v7 = vld [vmem:[%s2355_s30 + $0xd0] sm:$0xff]  ;;  %v400_v8 = vld [vmem:[%s2355_s30 + $0xe8] sm:$0xff] }
  0x5b   : > { %497 = vmatpush1.msra.mxu0 %v439_v13  ;;  %1914 = vmatprep.subr.mxu1 %v804_v46  ;;  %v399_v9 = vld [vmem:[%s2355_s30 + $0xe0] sm:$0xff]  ;;  %v402_v10 = vld [vmem:[%s2355_s30 + $0xf8] sm:$0xff]  ;;  %v401_v11 = vld [vmem:[%s2355_s30 + $0xf0] sm:$0xff] }
  0x5c   : > { %498 = vmatprep.subr.mxu0 %v2201_v0  ;;  %1915 = vmatpush3.msra.mxu1 %v804_v46  ;;  %v404_v12 = vld [vmem:[%s2355_s30 + $0x108] sm:$0xff]  ;;  %v403_v13 = vld [vmem:[%s2355_s30 + $0x100] sm:$0xff]  ;;  %v422_v35 = vld [vmem:[%s2355_s30 + $0x198] sm:$0xff] }
  0x5d   : > { %499 = vmatpush1.msra.mxu0 %v438_v14  ;;  %1916 = vmatprep.subr.mxu1 %v803_v47  ;;  %v406_v14 = vld [vmem:[%s2355_s30 + $0x118] sm:$0xff]  ;;  %v419_v34 = vld [vmem:[%s2355_s30 + $0x180] sm:$0xff] }
  0x5e   : > { %500 = vmatprep.subr.mxu0 %v2201_v0  ;;  %1917 = vmatpush3.msra.mxu1 %v803_v47  ;;  %v423_v38 = vld [vmem:[%s2355_s30 + $0x1a0] sm:$0xff]  ;;  %v426_v39 = vld [vmem:[%s2355_s30 + $0x1b8] sm:$0xff] }
  0x5f   : > { %501 = vmatpush1.msra.mxu0 %v437_v15  ;;  %1918 = vmatprep.subr.mxu1 %v802_v50  ;;  %v799_v15 = vld [vmem:[%s2837_s3 + $0x20] sm:$0xff]  ;;  %v430_v43 = vld [vmem:[%s2355_s30 + $0x1d8] sm:$0xff] }
  0x60   : > { %502 = vmatprep.subr.mxu0 %v2201_v0  ;;  %1919 = vmatpush3.msra.mxu1 %v802_v50  ;;  %v427_v42 = vld [vmem:[%s2355_s30 + $0x1c0] sm:$0xff]  ;;  %v434_v47 = vld [vmem:[%s2355_s30 + $0x1f8] sm:$0xff] }
  0x61   : > { %503 = vmatpush1.msra.mxu0 %v436_v16  ;;  %1920 = vmatprep.subr.mxu1 %v801_v51  ;;  %v405_v16 = vld [vmem:[%s2355_s30 + $0x110] sm:$0xff]  ;;  %v431_v46 = vld [vmem:[%s2355_s30 + $0x1e0] sm:$0xff] }
  0x62   : > { %504 = vmatprep.subr.mxu0 %v2201_v0  ;;  %1921 = vmatpush3.msra.mxu1 %v801_v51 }
  0x63   : > { %505 = vmatpush1.msra.mxu0 %v435_v17  ;;  %1922 = vmatprep.subr.mxu1 %v800_v54  ;;  %v798_v17 = vld [vmem:[%s2837_s3 + $0x18] sm:$0xff] }
  0x64   : > { %506 = vmatprep.subr.mxu0 %v2201_v0  ;;  %1923 = vmatpush3.msra.mxu1 %v800_v54 }
  0x65   : > { %507 = vmatpush2.msra.mxu0 %v466_v18  ;;  %1924 = vmatprep.subr.mxu1 %v799_v15  ;;  %v408_v18 = vld [vmem:[%s2355_s30 + $0x128] sm:$0xff] }
  0x66   : > { %508 = vmatprep.subr.mxu0 %v2201_v0  ;;  %1925 = vmatpush3.msra.mxu1 %v799_v15 }
  0x67   : > { %509 = vmatpush2.msra.mxu0 %v465_v19  ;;  %1926 = vmatprep.subr.mxu1 %v798_v17  ;;  %v797_v19 = vld [vmem:[%s2837_s3 + $0x10] sm:$0xff] }
  0x68   : > { %510 = vmatprep.subr.mxu0 %v2201_v0  ;;  %1927 = vmatpush3.msra.mxu1 %v798_v17 }
  0x69   : > { %511 = vmatpush2.msra.mxu0 %v464_v20  ;;  %1928 = vmatprep.subr.mxu1 %v797_v19  ;;  %v407_v20 = vld [vmem:[%s2355_s30 + $0x120] sm:$0xff] }
  0x6a   : > { %512 = vmatprep.subr.mxu0 %v2201_v0  ;;  %1929 = vmatpush3.msra.mxu1 %v797_v19 }
  0x6b   : > { %513 = vmatpush2.msra.mxu0 %v463_v21  ;;  %v796_v21 = vld [vmem:[%s2837_s3 + $0x8] sm:$0xff] }
  0x6c   : > { %514 = vmatprep.subr.mxu0 %v2201_v0  ;;  %1930 = vmatprep.subr.mxu1 %v796_v21 }
  0x6d   : > { %515 = vmatpush2.msra.mxu0 %v462_v22  ;;  %v410_v22 = vld [vmem:[%s2355_s30 + $0x138] sm:$0xff]  ;;  %1931 = vmatpush3.msra.mxu1 %v796_v21 }
  0x6e   : > { %516 = vmatprep.subr.mxu0 %v2201_v0 }
  0x6f   : > { %517 = vmatpush2.msra.mxu0 %v461_v23  ;;  %v795_v23 = vld [vmem:[%s2837_s3] sm:$0xff] }
  0x70   : > { %518 = vmatprep.subr.mxu0 %v2201_v0  ;;  %1932 = vmatprep.subr.mxu1 %v795_v23 }
  0x71   : > { %519 = vmatpush2.msra.mxu0 %v460_v24  ;;  %v409_v24 = vld [vmem:[%s2355_s30 + $0x130] sm:$0xff]  ;;  %1933 = vmatpush3.msra.mxu1 %v795_v23 }
  0x72   : > { %520 = vmatprep.subr.mxu0 %v2201_v0 }
  0x73   : > { %521 = vmatpush2.msra.mxu0 %v459_v25  ;;  %v412_v25 = vld [vmem:[%s2355_s30 + $0x148] sm:$0xff] }
  0x74   : > { %522 = vmatprep.subr.mxu0 %v2201_v0 }
  0x75   : > { %523 = vmatpush2.msra.mxu0 %v458_v26  ;;  %v411_v26 = vld [vmem:[%s2355_s30 + $0x140] sm:$0xff] }
  0x76   : > { %524 = vmatprep.subr.mxu0 %v2201_v0 }
  0x77   : > { %525 = vmatpush2.msra.mxu0 %v457_v27  ;;  %v414_v27 = vld [vmem:[%s2355_s30 + $0x158] sm:$0xff] }
  0x78   : > { %526 = vmatprep.subr.mxu0 %v2201_v0 }
  0x79   : > { %527 = vmatpush2.msra.mxu0 %v456_v28  ;;  %v413_v28 = vld [vmem:[%s2355_s30 + $0x150] sm:$0xff] }
  0x7a   : > { %528 = vmatprep.subr.mxu0 %v2201_v0 }
  0x7b   : > { %529 = vmatpush2.msra.mxu0 %v455_v29  ;;  %v416_v29 = vld [vmem:[%s2355_s30 + $0x168] sm:$0xff] }
  0x7c   : > { %530 = vmatprep.subr.mxu0 %v2201_v0 }
  0x7d   : > { %531 = vmatpush2.msra.mxu0 %v454_v30  ;;  %v415_v30 = vld [vmem:[%s2355_s30 + $0x160] sm:$0xff] }
  0x7e   : > { %532 = vmatprep.subr.mxu0 %v2201_v0 }
  0x7f   : > { %533 = vmatpush2.msra.mxu0 %v453_v31  ;;  %v418_v31 = vld [vmem:[%s2355_s30 + $0x178] sm:$0xff] }
  0x80   : > { %534 = vmatprep.subr.mxu0 %v2201_v0 }
  0x81   : > { %535 = vmatpush2.msra.mxu0 %v452_v32  ;;  %v417_v32 = vld [vmem:[%s2355_s30 + $0x170] sm:$0xff] }
  0x82   : > { %536 = vmatprep.subr.mxu0 %v2201_v0  ;;  %v392_v0 = vld [vmem:[%s2355_s30 + $0xa8] sm:$0xff] }
  0x83   : > { %537 = vmatpush2.msra.mxu0 %v451_v33  ;;  %v420_v33 = vld [vmem:[%s2355_s30 + $0x188] sm:$0xff] }
  0x84   : > { %539 = vmatmul.mubr.f32.vlgmr.msra.gmra.mxu0 %v371_v36  ;;  %v421_v36 = vld [vmem:[%s2355_s30 + $0x190] sm:$0xff] }
  0x85   : > { %543 = vmatprep.mubr.f32.mxu0 %v374_v37  ;;  %v424_v37 = vld [vmem:[%s2355_s30 + $0x1a8] sm:$0xff] }
  0x88   : > { %544 = vmatmul.mubr.f32.gmra.mxu0 %v373_v40  ;;  %v425_v40 = vld [vmem:[%s2355_s30 + $0x1b0] sm:$0xff] }
  0x89   : > { %548 = vmatprep.mubr.f32.mxu0 %v376_v41  ;;  %v428_v41 = vld [vmem:[%s2355_s30 + $0x1c8] sm:$0xff] }
  0x8c   : > { %549 = vmatmul.mubr.f32.gmra.mxu0 %v375_v44  ;;  %v429_v44 = vld [vmem:[%s2355_s30 + $0x1d0] sm:$0xff] }
  0x8d   : > { %553 = vmatprep.mubr.f32.mxu0 %v378_v45  ;;  %v432_v45 = vld [vmem:[%s2355_s30 + $0x1e8] sm:$0xff] }
  0x90   : > { %554 = vmatmul.mubr.f32.gmra.mxu0 %v377_v48  ;;  %v433_v48 = vld [vmem:[%s2355_s30 + $0x1f0] sm:$0xff]  ;;  %s1771_s30 = sshll.u32 %s2860_s20, 5 }
  0x91   : > { %558 = vmatprep.mubr.f32.mxu0 %v380_v49  ;;  %v2512_v49 = vld [vmem:[%s2836_s2] ss:$0 sm:$0xff]  ;;  %p366_p5 = scmp.lt.s32.totalorder %s1771_s30, 63 }
  0x93   : > { %s2866_s30 = smov (!%p366_p5, %s1771_s30), 63 }
  0x94   : > { %559 = vmatmul.mubr.f32.gmra.mxu0 %v379_v52  ;;  %s1772_s12 = sshll.u32 %s2866_s30, 3 }
  0x95   : > { %563 = vmatprep.mubr.f32.mxu0 %v382_v53  ;;  %v1146_v53 = vld [vmem:[%s2839_s5 + $0x38] sm:$0xff]  ;;  %s2662_s13 = scalar_lea.vmem %s2843_s9, %s1772_s12 }
  0x96   : > { %1982 = vmatprep.subr.mxu1 %v1146_v53 }
  0x98   : > { %564 = vmatmul.mubr.f32.gmra.mxu0 %v381_v55 }
  0x99   : > { %568 = vmatprep.mubr.f32.mxu0 %v384_v56 }
  0x9c   : > { %569 = vmatmul.mubr.f32.gmra.mxu0 %v383_v57 }
  0x9d   : > { %573 = vmatprep.mubr.f32.mxu0 %v386_v58 }
  0xa0   : > { %574 = vmatmul.mubr.f32.gmra.mxu0 %v385_v59 }
  0xa1   : > { %578 = vmatprep.mubr.f32.mxu0 %v388_v60 }
  0xa4   : > { %579 = vmatmul.mubr.f32.gmra.mxu0 %v387_v61 }
  0xa5   : > { %583 = vmatprep.mubr.f32.mxu0 %v390_v62 }
  0xa8   : > { %584 = vmatmul.mubr.f32.gmra.mxu0 %v389_v63  ;;  %v1145_v63 = vld [vmem:[%s2839_s5 + $0x30] sm:$0xff] }
  0xa9   : > { %588 = vmatprep.mubr.f32.mxu0 %v392_v0 }
  0xac   : > { %589 = vmatmul.mubr.f32.gmra.mxu0 %v391_v1 }
  0xad   : > { %593 = vmatprep.mubr.f32.mxu0 %v394_v2  ;;  %v1144_v2 = vld [vmem:[%s2839_s5 + $0x28] sm:$0xff] }
  0xb0   : > { %594 = vmatmul.mubr.f32.gmra.mxu0 %v393_v3 }
  0xb1   : > { %598 = vmatprep.mubr.f32.mxu0 %v396_v4 }
  0xb4   : > { %599 = vmatmul.mubr.f32.gmra.mxu0 %v395_v5 }
  0xb5   : > { %603 = vmatprep.mubr.f32.mxu0 %v398_v6  ;;  %v1143_v6 = vld [vmem:[%s2839_s5 + $0x20] sm:$0xff] }
  0xb8   : > { %604 = vmatmul.mubr.f32.gmra.mxu0 %v397_v7 }
  0xb9   : > { %608 = vmatprep.mubr.f32.mxu0 %v400_v8 }
  0xbc   : > { %609 = vmatmul.mubr.f32.gmra.mxu0 %v399_v9 }
  0xbd   : > { %613 = vmatprep.mubr.f32.mxu0 %v402_v10 }
  0xc0   : > { %614 = vmatmul.mubr.f32.gmra.mxu0 %v401_v11 }
  0xc1   : > { %618 = vmatprep.mubr.f32.mxu0 %v404_v12 }
  0xc4   : > { %619 = vmatmul.mubr.f32.gmra.mxu0 %v403_v13 }
  0xc5   : > { %623 = vmatprep.mubr.f32.mxu0 %v406_v14 }
  0xc8   : > { %624 = vmatmul.mubr.f32.gmra.mxu0 %v405_v16 }
  0xc9   : > { %628 = vmatprep.mubr.f32.mxu0 %v408_v18 }
  0xcc   : > { %629 = vmatmul.mubr.f32.gmra.mxu0 %v407_v20 }
  0xcd   : > { %633 = vmatprep.mubr.f32.mxu0 %v410_v22 }
  0xd0   : > { %634 = vmatmul.mubr.f32.gmra.mxu0 %v409_v24 }
  0xd1   : > { %638 = vmatprep.mubr.f32.mxu0 %v412_v25 }
  0xd4   : > { %639 = vmatmul.mubr.f32.gmra.mxu0 %v411_v26 }
  0xd5   : > { %643 = vmatprep.mubr.f32.mxu0 %v414_v27 }
  0xd8   : > { %644 = vmatmul.mubr.f32.gmra.mxu0 %v413_v28 }
  0xd9   : > { %648 = vmatprep.mubr.f32.mxu0 %v416_v29 }
  0xdc   : > { %649 = vmatmul.mubr.f32.gmra.mxu0 %v415_v30 }
  0xdd   : > { %653 = vmatprep.mubr.f32.mxu0 %v418_v31 }
  0xe0   : > { %654 = vmatmul.mubr.f32.gmra.mxu0 %v417_v32 }
  0xe1   : > { %658 = vmatprep.mubr.f32.mxu0 %v420_v33 }
  0xe4   : > { %659 = vmatmul.mubr.f32.gmra.mxu0 %v419_v34 }
  0xe5   : > { %663 = vmatprep.mubr.f32.mxu0 %v422_v35 }
  0xe8   : > { %664 = vmatmul.mubr.f32.gmra.mxu0 %v421_v36 }
  0xe9   : > { %668 = vmatprep.mubr.f32.mxu0 %v424_v37 }
  0xec   : > { %669 = vmatmul.mubr.f32.gmra.mxu0 %v423_v38 }
  0xed   : > { %673 = vmatprep.mubr.f32.mxu0 %v426_v39 }
  0xf0   : > { %674 = vmatmul.mubr.f32.gmra.mxu0 %v425_v40 }
  0xf1   : > { %678 = vmatprep.mubr.f32.mxu0 %v428_v41 }
  0xf4   : > { %679 = vmatmul.mubr.f32.gmra.mxu0 %v427_v42 }
  0xf5   : > { %683 = vmatprep.mubr.f32.mxu0 %v430_v43 }
  0xf8   : > { %684 = vmatmul.mubr.f32.gmra.mxu0 %v429_v44 }
  0xf9   : > { %688 = vmatprep.mubr.f32.mxu0 %v432_v45 }
  0xfc   : > { %689 = vmatmul.mubr.f32.gmra.mxu0 %v431_v46 }
  0xfd   : > { %693 = vmatprep.mubr.f32.mxu0 %v434_v47 }
 0x100   : > { %694 = vmatmul.mubr.f32.gmra.mxu0 %v433_v48 }
 0x144   : > { %v540_v50 = vpop.f32.mrf.mxu0 }
 0x145   : > { %v541_v51 = vadd.f32 %v2512_v49, %v540_v50 }
 0x146   : > { %v542_v52 = vpop.f32.mrf.mxu0 }
 0x147   : > { %vm699_vm0 = vcmp.gt.f32.partialorder %v541_v51, 0.0  ;;  %v731_v54 = vmul.f32 0.2, %v541_v51 }
 0x148   : > { %v545_v55 = vpop.f32.mrf.mxu0 }
 0x149   : > { %v546_v56 = vadd.f32 %v2512_v49, %v545_v55  ;;  %v763_v57 = vsel %vm699_vm0, %v541_v51, %v731_v54 }
 0x14a   : > { %v547_v58 = vpop.f32.mrf.mxu0  ;;  %1934 = vmatprep.mubr.f32.mxu1 %v763_v57 }
 0x14b   : > { %v732_v59 = vmul.f32 0.2, %v546_v56  ;;  %vm700_vm1 = vcmp.gt.f32.partialorder %v546_v56, 0.0 }
 0x14c   : > { %v550_v60 = vpop.f32.mrf.mxu0 }
 0x14d   : > { %v551_v61 = vadd.f32 %v2512_v49, %v550_v60  ;;  %v764_v62 = vsel %vm700_vm1, %v546_v56, %v732_v59 }
 0x14e   : > { %v552_v0 = vpop.f32.mrf.mxu0  ;;  %1935 = vmatmul.mubr.f32.vlgmr.msra.gmra.mxu1 %v764_v62 }
 0x14f   : > { %v733_v1 = vmul.f32 0.2, %v551_v61  ;;  %vm701_vm2 = vcmp.gt.f32.partialorder %v551_v61, 0.0  ;;  %1983 = vmatpush3.msra.mxu1 %v1146_v53 }
 0x150   : > { %v555_v3 = vpop.f32.mrf.mxu0  ;;  %1984 = vmatprep.subr.mxu1 %v1145_v63 }
 0x151   : > { %v556_v4 = vadd.f32 %v2512_v49, %v555_v3  ;;  %v765_v5 = vsel %vm701_vm2, %v551_v61, %v733_v1  ;;  %1985 = vmatpush3.msra.mxu1 %v1145_v63 }
 0x152   : > { %v557_v7 = vpop.f32.mrf.mxu0  ;;  %1937 = vmatprep.mubr.f32.mxu1 %v765_v5  ;;  %1986 = vmatprep.subr.mxu1 %v1144_v2 }
 0x153   : > { %v734_v8 = vmul.f32 0.2, %v556_v4  ;;  %vm702_vm3 = vcmp.gt.f32.partialorder %v556_v4, 0.0  ;;  %1987 = vmatpush3.msra.mxu1 %v1144_v2 }
 0x154   : > { %v560_v9 = vpop.f32.mrf.mxu0  ;;  %1988 = vmatprep.subr.mxu1 %v1143_v6 }
 0x155   : > { %v561_v10 = vadd.f32 %v2512_v49, %v560_v9  ;;  %v766_v11 = vsel %vm702_vm3, %v556_v4, %v734_v8  ;;  %1989 = vmatpush3.msra.mxu1 %v1143_v6 }
 0x156   : > { %v562_v12 = vpop.f32.mrf.mxu0  ;;  %1938 = vmatmul.mubr.f32.gmra.mxu1 %v766_v11 }
 0x157   : > { %v735_v13 = vmul.f32 0.2, %v561_v10  ;;  %vm703_vm4 = vcmp.gt.f32.partialorder %v561_v10, 0.0 }
 0x158   : > { %v565_v14 = vpop.f32.mrf.mxu0 }
 0x159   : > { %v566_v15 = vadd.f32 %v2512_v49, %v565_v14  ;;  %v767_v16 = vsel %vm703_vm4, %v561_v10, %v735_v13 }
 0x15a   : > { %v567_v17 = vpop.f32.mrf.mxu0  ;;  %1940 = vmatprep.mubr.f32.mxu1 %v767_v16 }
 0x15b   : > { %v736_v18 = vmul.f32 0.2, %v566_v15  ;;  %vm704_vm5 = vcmp.gt.f32.partialorder %v566_v15, 0.0 }
 0x15c   : > { %v570_v19 = vpop.f32.mrf.mxu0 }
 0x15d   : > { %v571_v20 = vadd.f32 %v2512_v49, %v570_v19  ;;  %v768_v21 = vsel %vm704_vm5, %v566_v15, %v736_v18 }
 0x15e   : > { %v572_v22 = vpop.f32.mrf.mxu0  ;;  %1941 = vmatmul.mubr.f32.gmra.mxu1 %v768_v21 }
 0x15f   : > { %v737_v23 = vmul.f32 0.2, %v571_v20  ;;  %vm705_vm6 = vcmp.gt.f32.partialorder %v571_v20, 0.0 }
 0x160   : > { %v575_v24 = vpop.f32.mrf.mxu0 }
 0x161   : > { %v576_v25 = vadd.f32 %v2512_v49, %v575_v24  ;;  %v769_v26 = vsel %vm705_vm6, %v571_v20, %v737_v23  ;;  %v1142_v20 = vld [vmem:[%s2839_s5 + $0x18] sm:$0xff]  ;;  %v1141_v23 = vld [vmem:[%s2839_s5 + $0x10] sm:$0xff] }
 0x162   : > { %v577_v27 = vpop.f32.mrf.mxu0  ;;  %1943 = vmatprep.mubr.f32.mxu1 %v769_v26  ;;  %1990 = vmatprep.subr.mxu1 %v1142_v20 }
 0x163   : > { %v738_v28 = vmul.f32 0.2, %v576_v25  ;;  %vm706_vm7 = vcmp.gt.f32.partialorder %v576_v25, 0.0  ;;  %1991 = vmatpush3.msra.mxu1 %v1142_v20  ;;  %v1140_v27 = vld [vmem:[%s2839_s5 + $0x8] sm:$0xff] }
 0x164   : > { %v580_v29 = vpop.f32.mrf.mxu0  ;;  %1992 = vmatprep.subr.mxu1 %v1141_v23 }
 0x165   : > { %v581_v30 = vadd.f32 %v2512_v49, %v580_v29  ;;  %v770_v31 = vsel %vm706_vm7, %v576_v25, %v738_v28  ;;  %1993 = vmatpush3.msra.mxu1 %v1141_v23  ;;  %v1139_v29 = vld [vmem:[%s2839_s5] sm:$0xff] }
 0x166   : > { %v582_v32 = vpop.f32.mrf.mxu0  ;;  %1944 = vmatmul.mubr.f32.gmra.mxu1 %v770_v31  ;;  %1994 = vmatprep.subr.mxu1 %v1140_v27 }
 0x167   : > { %v739_v33 = vmul.f32 0.2, %v581_v30  ;;  %vm707_vm8 = vcmp.gt.f32.partialorder %v581_v30, 0.0  ;;  %1995 = vmatpush3.msra.mxu1 %v1140_v27 }
 0x168   : > { %v585_v34 = vpop.f32.mrf.mxu0  ;;  %1996 = vmatprep.subr.mxu1 %v1139_v29 }
 0x169   : > { %v586_v35 = vadd.f32 %v2512_v49, %v585_v34  ;;  %v771_v36 = vsel %vm707_vm8, %v581_v30, %v739_v33  ;;  %1997 = vmatpush3.msra.mxu1 %v1139_v29 }
 0x16a   : > { %v587_v37 = vpop.f32.mrf.mxu0  ;;  %1946 = vmatprep.mubr.f32.mxu1 %v771_v36 }
 0x16b   : > { %v740_v38 = vmul.f32 0.2, %v586_v35  ;;  %vm708_vm9 = vcmp.gt.f32.partialorder %v586_v35, 0.0 }
 0x16c   : > { %v590_v39 = vpop.f32.mrf.mxu0 }
 0x16d   : > { %v591_v40 = vadd.f32 %v2512_v49, %v590_v39  ;;  %v772_v41 = vsel %vm708_vm9, %v586_v35, %v740_v38 }
 0x16e   : > { %v592_v42 = vpop.f32.mrf.mxu0  ;;  %1947 = vmatmul.mubr.f32.gmra.mxu1 %v772_v41 }
 0x16f   : > { %v741_v43 = vmul.f32 0.2, %v591_v40  ;;  %vm709_vm10 = vcmp.gt.f32.partialorder %v591_v40, 0.0 }
 0x170   : > { %v595_v44 = vpop.f32.mrf.mxu0 }
 0x171   : > { %v596_v45 = vadd.f32 %v2512_v49, %v595_v44  ;;  %v773_v46 = vsel %vm709_vm10, %v591_v40, %v741_v43 }
 0x172   : > { %v597_v47 = vpop.f32.mrf.mxu0  ;;  %1949 = vmatprep.mubr.f32.mxu1 %v773_v46 }
 0x173   : > { %v742_v48 = vmul.f32 0.2, %v596_v45  ;;  %vm710_vm11 = vcmp.gt.f32.partialorder %v596_v45, 0.0 }
 0x174   : > { %v600_v50 = vpop.f32.mrf.mxu0 }
 0x175   : > { %v601_v51 = vadd.f32 %v2512_v49, %v600_v50  ;;  %v774_v52 = vsel %vm710_vm11, %v596_v45, %v742_v48 }
 0x176   : > { %v602_v53 = vpop.f32.mrf.mxu0  ;;  %1950 = vmatmul.mubr.f32.gmra.mxu1 %v774_v52 }
 0x177   : > { %v743_v54 = vmul.f32 0.2, %v601_v51  ;;  %vm711_vm12 = vcmp.gt.f32.partialorder %v601_v51, 0.0 }
 0x178   : > { %v605_v55 = vpop.f32.mrf.mxu0 }
 0x179   : > { %v606_v56 = vadd.f32 %v2512_v49, %v605_v55  ;;  %v775_v57 = vsel %vm711_vm12, %v601_v51, %v743_v54 }
 0x17a   : > { %v607_v58 = vpop.f32.mrf.mxu0  ;;  %1952 = vmatprep.mubr.f32.mxu1 %v775_v57 }
 0x17b   : > { %v744_v59 = vmul.f32 0.2, %v606_v56  ;;  %vm712_vm13 = vcmp.gt.f32.partialorder %v606_v56, 0.0 }
 0x17c   : > { %v610_v60 = vpop.f32.mrf.mxu0 }
 0x17d   : > { %v611_v61 = vadd.f32 %v2512_v49, %v610_v60  ;;  %v776_v62 = vsel %vm712_vm13, %v606_v56, %v744_v59 }
 0x17e   : > { %v612_v63 = vpop.f32.mrf.mxu0  ;;  %1953 = vmatmul.mubr.f32.gmra.mxu1 %v776_v62 }
 0x17f   : > { %v745_v0 = vmul.f32 0.2, %v611_v61  ;;  %vm713_vm14 = vcmp.gt.f32.partialorder %v611_v61, 0.0 }
 0x180   : > { %v615_v1 = vpop.f32.mrf.mxu0 }
 0x181   : > { %v616_v2 = vadd.f32 %v2512_v49, %v615_v1  ;;  %v777_v3 = vsel %vm713_vm14, %v611_v61, %v745_v0 }
 0x182   : > { %v617_v4 = vpop.f32.mrf.mxu0  ;;  %1955 = vmatprep.mubr.f32.mxu1 %v777_v3 }
 0x183   : > { %v746_v5 = vmul.f32 0.2, %v616_v2  ;;  %vm714_vm15 = vcmp.gt.f32.partialorder %v616_v2, 0.0 }
 0x184   : > { %v620_v6 = vpop.f32.mrf.mxu0 }
 0x185   : > { %v621_v7 = vadd.f32 %v2512_v49, %v620_v6  ;;  %v778_v8 = vsel %vm714_vm15, %v616_v2, %v746_v5 }
 0x186   : > { %v622_v9 = vpop.f32.mrf.mxu0  ;;  %1956 = vmatmul.mubr.f32.gmra.mxu1 %v778_v8 }
 0x187   : > { %v747_v10 = vmul.f32 0.2, %v621_v7  ;;  %vm715_vm0 = vcmp.gt.f32.partialorder %v621_v7, 0.0 }
 0x188   : > { %v625_v11 = vpop.f32.mrf.mxu0 }
 0x189   : > { %v626_v12 = vadd.f32 %v2512_v49, %v625_v11  ;;  %v779_v13 = vsel %vm715_vm0, %v621_v7, %v747_v10 }
 0x18a   : > { %v627_v14 = vpop.f32.mrf.mxu0  ;;  %1958 = vmatprep.mubr.f32.mxu1 %v779_v13 }
 0x18b   : > { %v748_v15 = vmul.f32 0.2, %v626_v12  ;;  %vm716_vm1 = vcmp.gt.f32.partialorder %v626_v12, 0.0 }
 0x18c   : > { %v630_v16 = vpop.f32.mrf.mxu0 }
 0x18d   : > { %v631_v17 = vadd.f32 %v2512_v49, %v630_v16  ;;  %v780_v18 = vsel %vm716_vm1, %v626_v12, %v748_v15 }
 0x18e   : > { %v632_v19 = vpop.f32.mrf.mxu0  ;;  %1959 = vmatmul.mubr.f32.gmra.mxu1 %v780_v18 }
 0x18f   : > { %v749_v21 = vmul.f32 0.2, %v631_v17  ;;  %vm717_vm2 = vcmp.gt.f32.partialorder %v631_v17, 0.0 }
 0x190   : > { %v635_v22 = vpop.f32.mrf.mxu0 }
 0x191   : > { %v636_v24 = vadd.f32 %v2512_v49, %v635_v22  ;;  %v781_v25 = vsel %vm717_vm2, %v631_v17, %v749_v21  ;;  %vm1154_vm2 = vcmask 523264  }
 0x192   : > { %v637_v26 = vpop.f32.mrf.mxu0  ;;  %1961 = vmatprep.mubr.f32.mxu1 %v781_v25 }
 0x193   : > { %v750_v28 = vmul.f32 0.2, %v636_v24  ;;  %vm718_vm3 = vcmp.gt.f32.partialorder %v636_v24, 0.0 }
 0x194   : > { %v640_v30 = vpop.f32.mrf.mxu0 }
 0x195   : > { %v641_v31 = vadd.f32 %v2512_v49, %v640_v30  ;;  %v782_v32 = vsel %vm718_vm3, %v636_v24, %v750_v28  ;;  %v2573_v28 = vld [vmem:[%s2838_s4] ss:$0 sm:$0xff] }
 0x196   : > { %v642_v33 = vpop.f32.mrf.mxu0  ;;  %1962 = vmatmul.mubr.f32.gmra.mxu1 %v782_v32 }
 0x197   : > { %v751_v34 = vmul.f32 0.2, %v641_v31  ;;  %vm719_vm4 = vcmp.gt.f32.partialorder %v641_v31, 0.0 }
 0x198   : > { %v645_v35 = vpop.f32.mrf.mxu0 }
 0x199   : > { %v646_v36 = vadd.f32 %v2512_v49, %v645_v35  ;;  %v783_v37 = vsel %vm719_vm4, %v641_v31, %v751_v34 }
 0x19a   : > { %v647_v38 = vpop.f32.mrf.mxu0  ;;  %1964 = vmatprep.mubr.f32.mxu1 %v783_v37 }
 0x19b   : > { %v752_v39 = vmul.f32 0.2, %v646_v36  ;;  %vm720_vm5 = vcmp.gt.f32.partialorder %v646_v36, 0.0 }
 0x19c   : > { %v650_v40 = vpop.f32.mrf.mxu0 }
 0x19d   : > { %v651_v41 = vadd.f32 %v2512_v49, %v650_v40  ;;  %v784_v42 = vsel %vm720_vm5, %v646_v36, %v752_v39 }
 0x19e   : > { %v652_v43 = vpop.f32.mrf.mxu0  ;;  %1965 = vmatmul.mubr.f32.gmra.mxu1 %v784_v42 }
 0x19f   : > { %v753_v44 = vmul.f32 0.2, %v651_v41  ;;  %vm721_vm6 = vcmp.gt.f32.partialorder %v651_v41, 0.0 }
 0x1a0   : > { %v655_v45 = vpop.f32.mrf.mxu0 }
 0x1a1   : > { %v656_v46 = vadd.f32 %v2512_v49, %v655_v45  ;;  %v785_v47 = vsel %vm721_vm6, %v651_v41, %v753_v44 }
 0x1a2   : > { %v657_v48 = vpop.f32.mrf.mxu0  ;;  %1967 = vmatprep.mubr.f32.mxu1 %v785_v47 }
 0x1a3   : > { %v754_v50 = vmul.f32 0.2, %v656_v46  ;;  %vm722_vm7 = vcmp.gt.f32.partialorder %v656_v46, 0.0 }
 0x1a4   : > { %v660_v51 = vpop.f32.mrf.mxu0 }
 0x1a5   : > { %v661_v52 = vadd.f32 %v2512_v49, %v660_v51  ;;  %v786_v53 = vsel %vm722_vm7, %v656_v46, %v754_v50 }
 0x1a6   : > { %v662_v54 = vpop.f32.mrf.mxu0  ;;  %1968 = vmatmul.mubr.f32.gmra.mxu1 %v786_v53 }
 0x1a7   : > { %v755_v55 = vmul.f32 0.2, %v661_v52  ;;  %vm723_vm8 = vcmp.gt.f32.partialorder %v661_v52, 0.0 }
 0x1a8   : > { %v665_v56 = vpop.f32.mrf.mxu0 }
 0x1a9   : > { %v666_v57 = vadd.f32 %v2512_v49, %v665_v56  ;;  %v787_v58 = vsel %vm723_vm8, %v661_v52, %v755_v55 }
 0x1aa   : > { %v667_v59 = vpop.f32.mrf.mxu0  ;;  %1970 = vmatprep.mubr.f32.mxu1 %v787_v58 }
 0x1ab   : > { %v756_v60 = vmul.f32 0.2, %v666_v57  ;;  %vm724_vm9 = vcmp.gt.f32.partialorder %v666_v57, 0.0 }
 0x1ac   : > { %v670_v61 = vpop.f32.mrf.mxu0 }
 0x1ad   : > { %v671_v62 = vadd.f32 %v2512_v49, %v670_v61  ;;  %v788_v63 = vsel %vm724_vm9, %v666_v57, %v756_v60 }
 0x1ae   : > { %v672_v0 = vpop.f32.mrf.mxu0  ;;  %1971 = vmatmul.mubr.f32.gmra.mxu1 %v788_v63 }
 0x1af   : > { %v757_v1 = vmul.f32 0.2, %v671_v62  ;;  %vm725_vm10 = vcmp.gt.f32.partialorder %v671_v62, 0.0 }
 0x1b0   : > { %v675_v2 = vpop.f32.mrf.mxu0 }
 0x1b1   : > { %v676_v3 = vadd.f32 %v2512_v49, %v675_v2  ;;  %v789_v4 = vsel %vm725_vm10, %v671_v62, %v757_v1 }
 0x1b2   : > { %v677_v5 = vpop.f32.mrf.mxu0  ;;  %1973 = vmatprep.mubr.f32.mxu1 %v789_v4 }
 0x1b3   : > { %v758_v6 = vmul.f32 0.2, %v676_v3  ;;  %vm726_vm11 = vcmp.gt.f32.partialorder %v676_v3, 0.0 }
 0x1b4   : > { %v680_v7 = vpop.f32.mrf.mxu0 }
 0x1b5   : > { %v681_v8 = vadd.f32 %v2512_v49, %v680_v7  ;;  %v790_v9 = vsel %vm726_vm11, %v676_v3, %v758_v6 }
 0x1b6   : > { %v682_v10 = vpop.f32.mrf.mxu0  ;;  %1974 = vmatmul.mubr.f32.gmra.mxu1 %v790_v9 }
 0x1b7   : > { %v759_v11 = vmul.f32 0.2, %v681_v8  ;;  %vm727_vm12 = vcmp.gt.f32.partialorder %v681_v8, 0.0 }
 0x1b8   : > { %v685_v12 = vpop.f32.mrf.mxu0 }
 0x1b9   : > { %v686_v13 = vadd.f32 %v2512_v49, %v685_v12  ;;  %v791_v14 = vsel %vm727_vm12, %v681_v8, %v759_v11 }
 0x1ba   : > { %v687_v15 = vpop.f32.mrf.mxu0  ;;  %1976 = vmatprep.mubr.f32.mxu1 %v791_v14 }
 0x1bb   : > { %v760_v16 = vmul.f32 0.2, %v686_v13  ;;  %vm728_vm13 = vcmp.gt.f32.partialorder %v686_v13, 0.0 }
 0x1bc   : > { %v690_v17 = vpop.f32.mrf.mxu0 }
 0x1bd   : > { %v691_v18 = vadd.f32 %v2512_v49, %v690_v17  ;;  %v792_v19 = vsel %vm728_vm13, %v686_v13, %v760_v16 }
 0x1be   : > { %v692_v20 = vpop.f32.mrf.mxu0  ;;  %1977 = vmatmul.mubr.f32.gmra.mxu1 %v792_v19 }
 0x1bf   : > { %v761_v21 = vmul.f32 0.2, %v691_v18  ;;  %vm729_vm14 = vcmp.gt.f32.partialorder %v691_v18, 0.0 }
 0x1c0   : > { %v695_v22 = vpop.f32.mrf.mxu0 }
 0x1c1   : > { %v696_v23 = vadd.f32 %v2512_v49, %v695_v22  ;;  %v793_v24 = vsel %vm729_vm14, %v691_v18, %v761_v21 }
 0x1c2   : > { %v697_v25 = vpop.f32.mrf.mxu0  ;;  %1979 = vmatprep.mubr.f32.mxu1 %v793_v24 }
 0x1c3   : > { %v762_v26 = vmul.f32 0.2, %v696_v23  ;;  %vm730_vm15 = vcmp.gt.f32.partialorder %v696_v23, 0.0 }
 0x1c5   : > { %v794_v27 = vsel %vm730_vm15, %v696_v23, %v762_v26 }
 0x1c6   : > { %1980 = vmatmul.mubr.f32.gmra.mxu1 %v794_v27 }
 0x20e   : > { %v1936_v29 = vpop.f32.mrf.mxu1 }
 0x20f   : > { %v890_v30 = vadd.f32 %v1936_v29, %v2573_v28 }
 0x210   : > { %v884_v31 = vpop.f32.mrf.mxu1 }
 0x211   : > { %v885_v32 = vadd.f32 %v2573_v28, %v884_v31  ;;  %v1076_v33 = vmul.f32 0.2, %v890_v30  ;;  %vm1044_vm0 = vcmp.gt.f32.partialorder %v890_v30, 0.0 }
 0x213   : > { %vm1043_vm1 = vcmp.gt.f32.partialorder %v885_v32, 0.0  ;;  %v1075_v49 = vmul.f32 0.2, %v885_v32  ;;  %v1108_v35 = vsel %vm1044_vm0, %v890_v30, %v1076_v33 }
 0x215   : > { %v1107_v34 = vsel %vm1043_vm1, %v885_v32, %v1075_v49 }
 0x216   : > { %v1939_v36 = vpop.f32.mrf.mxu1  ;;  %1998 = vmatprep.mubr.msk.f32.mxu1 %vm1154_vm2, %v1107_v34 }
 0x217   : > { %v900_v37 = vadd.f32 %v1939_v36, %v2573_v28  ;;  %1999 = vmatmul.mubr.msk.f32.vlgmr.msra.gmra.mxu1 %vm1154_vm2, %v1108_v35 }
 0x218   : > { %v894_v38 = vpop.f32.mrf.mxu1 }
 0x219   : > { %v895_v39 = vadd.f32 %v2573_v28, %v894_v38  ;;  %v1078_v40 = vmul.f32 0.2, %v900_v37  ;;  %vm1046_vm3 = vcmp.gt.f32.partialorder %v900_v37, 0.0 }
 0x21b   : > { %vm1045_vm4 = vcmp.gt.f32.partialorder %v895_v39, 0.0  ;;  %v1077_v41 = vmul.f32 0.2, %v895_v39  ;;  %v1110_v44 = vsel %vm1046_vm3, %v900_v37, %v1078_v40 }
 0x21d   : > { %v1109_v42 = vsel %vm1045_vm4, %v895_v39, %v1077_v41 }
 0x21e   : > { %v1942_v43 = vpop.f32.mrf.mxu1  ;;  %2001 = vmatprep.mubr.msk.f32.mxu1 %vm1154_vm2, %v1109_v42 }
 0x21f   : > { %v910_v45 = vadd.f32 %v1942_v43, %v2573_v28  ;;  %2002 = vmatmul.mubr.msk.f32.gmra.mxu1 %vm1154_vm2, %v1110_v44 }
 0x220   : > { %v904_v46 = vpop.f32.mrf.mxu1 }
 0x221   : > { %v905_v47 = vadd.f32 %v2573_v28, %v904_v46  ;;  %v1080_v48 = vmul.f32 0.2, %v910_v45  ;;  %vm1048_vm5 = vcmp.gt.f32.partialorder %v910_v45, 0.0 }
 0x223   : > { %vm1047_vm6 = vcmp.gt.f32.partialorder %v905_v47, 0.0  ;;  %v1079_v50 = vmul.f32 0.2, %v905_v47  ;;  %v1112_v53 = vsel %vm1048_vm5, %v910_v45, %v1080_v48 }
 0x225   : > { %v1111_v51 = vsel %vm1047_vm6, %v905_v47, %v1079_v50 }
 0x226   : > { %v1945_v52 = vpop.f32.mrf.mxu1  ;;  %2004 = vmatprep.mubr.msk.f32.mxu1 %vm1154_vm2, %v1111_v51 }
 0x227   : > { %v920_v54 = vadd.f32 %v1945_v52, %v2573_v28  ;;  %2005 = vmatmul.mubr.msk.f32.gmra.mxu1 %vm1154_vm2, %v1112_v53 }
 0x228   : > { %v914_v55 = vpop.f32.mrf.mxu1 }
 0x229   : > { %v915_v56 = vadd.f32 %v2573_v28, %v914_v55  ;;  %v1082_v57 = vmul.f32 0.2, %v920_v54  ;;  %vm1050_vm7 = vcmp.gt.f32.partialorder %v920_v54, 0.0 }
 0x22b   : > { %vm1049_vm8 = vcmp.gt.f32.partialorder %v915_v56, 0.0  ;;  %v1081_v58 = vmul.f32 0.2, %v915_v56  ;;  %v1114_v61 = vsel %vm1050_vm7, %v920_v54, %v1082_v57 }
 0x22d   : > { %v1113_v59 = vsel %vm1049_vm8, %v915_v56, %v1081_v58 }
 0x22e   : > { %v1948_v60 = vpop.f32.mrf.mxu1  ;;  %2007 = vmatprep.mubr.msk.f32.mxu1 %vm1154_vm2, %v1113_v59 }
 0x22f   : > { %v930_v62 = vadd.f32 %v1948_v60, %v2573_v28  ;;  %2008 = vmatmul.mubr.msk.f32.gmra.mxu1 %vm1154_vm2, %v1114_v61 }
 0x230   : > { %v924_v63 = vpop.f32.mrf.mxu1 }
 0x231   : > { %v925_v0 = vadd.f32 %v2573_v28, %v924_v63  ;;  %v1084_v1 = vmul.f32 0.2, %v930_v62  ;;  %vm1052_vm9 = vcmp.gt.f32.partialorder %v930_v62, 0.0 }
 0x233   : > { %vm1051_vm10 = vcmp.gt.f32.partialorder %v925_v0, 0.0  ;;  %v1083_v2 = vmul.f32 0.2, %v925_v0  ;;  %v1116_v5 = vsel %vm1052_vm9, %v930_v62, %v1084_v1 }
 0x235   : > { %v1115_v3 = vsel %vm1051_vm10, %v925_v0, %v1083_v2 }
 0x236   : > { %v1951_v4 = vpop.f32.mrf.mxu1  ;;  %2010 = vmatprep.mubr.msk.f32.mxu1 %vm1154_vm2, %v1115_v3 }
 0x237   : > { %v940_v6 = vadd.f32 %v1951_v4, %v2573_v28  ;;  %2011 = vmatmul.mubr.msk.f32.gmra.mxu1 %vm1154_vm2, %v1116_v5 }
 0x238   : > { %v934_v7 = vpop.f32.mrf.mxu1 }
 0x239   : > { %v935_v8 = vadd.f32 %v2573_v28, %v934_v7  ;;  %v1086_v9 = vmul.f32 0.2, %v940_v6  ;;  %vm1054_vm11 = vcmp.gt.f32.partialorder %v940_v6, 0.0 }
 0x23b   : > { %vm1053_vm12 = vcmp.gt.f32.partialorder %v935_v8, 0.0  ;;  %v1085_v10 = vmul.f32 0.2, %v935_v8  ;;  %v1118_v13 = vsel %vm1054_vm11, %v940_v6, %v1086_v9 }
 0x23d   : > { %v1117_v11 = vsel %vm1053_vm12, %v935_v8, %v1085_v10 }
 0x23e   : > { %v1954_v12 = vpop.f32.mrf.mxu1  ;;  %2013 = vmatprep.mubr.msk.f32.mxu1 %vm1154_vm2, %v1117_v11 }
 0x23f   : > { %v950_v14 = vadd.f32 %v1954_v12, %v2573_v28  ;;  %2014 = vmatmul.mubr.msk.f32.gmra.mxu1 %vm1154_vm2, %v1118_v13 }
 0x240   : > { %v944_v15 = vpop.f32.mrf.mxu1 }
 0x241   : > { %v945_v16 = vadd.f32 %v2573_v28, %v944_v15  ;;  %v1088_v17 = vmul.f32 0.2, %v950_v14  ;;  %vm1056_vm13 = vcmp.gt.f32.partialorder %v950_v14, 0.0 }
 0x243   : > { %vm1055_vm14 = vcmp.gt.f32.partialorder %v945_v16, 0.0  ;;  %v1087_v18 = vmul.f32 0.2, %v945_v16  ;;  %v1120_v21 = vsel %vm1056_vm13, %v950_v14, %v1088_v17 }
 0x245   : > { %v1119_v19 = vsel %vm1055_vm14, %v945_v16, %v1087_v18 }
 0x246   : > { %v1957_v20 = vpop.f32.mrf.mxu1  ;;  %2016 = vmatprep.mubr.msk.f32.mxu1 %vm1154_vm2, %v1119_v19 }
 0x247   : > { %v960_v22 = vadd.f32 %v1957_v20, %v2573_v28  ;;  %2017 = vmatmul.mubr.msk.f32.gmra.mxu1 %vm1154_vm2, %v1120_v21 }
 0x248   : > { %v954_v23 = vpop.f32.mrf.mxu1 }
 0x249   : > { %v955_v24 = vadd.f32 %v2573_v28, %v954_v23  ;;  %v1090_v25 = vmul.f32 0.2, %v960_v22  ;;  %vm1058_vm15 = vcmp.gt.f32.partialorder %v960_v22, 0.0 }
 0x24b   : > { %vm1057_vm0 = vcmp.gt.f32.partialorder %v955_v24, 0.0  ;;  %v1089_v26 = vmul.f32 0.2, %v955_v24  ;;  %v1122_v30 = vsel %vm1058_vm15, %v960_v22, %v1090_v25 }
 0x24d   : > { %v1121_v27 = vsel %vm1057_vm0, %v955_v24, %v1089_v26 }
 0x24e   : > { %v1960_v29 = vpop.f32.mrf.mxu1  ;;  %2019 = vmatprep.mubr.msk.f32.mxu1 %vm1154_vm2, %v1121_v27 }
 0x24f   : > { %v970_v31 = vadd.f32 %v1960_v29, %v2573_v28  ;;  %2020 = vmatmul.mubr.msk.f32.gmra.mxu1 %vm1154_vm2, %v1122_v30 }
 0x250   : > { %v964_v32 = vpop.f32.mrf.mxu1 }
 0x251   : > { %v965_v33 = vadd.f32 %v2573_v28, %v964_v32  ;;  %v1092_v49 = vmul.f32 0.2, %v970_v31  ;;  %vm1060_vm1 = vcmp.gt.f32.partialorder %v970_v31, 0.0 }
 0x253   : > { %vm1059_vm3 = vcmp.gt.f32.partialorder %v965_v33, 0.0  ;;  %v1091_v34 = vmul.f32 0.2, %v965_v33  ;;  %v1124_v37 = vsel %vm1060_vm1, %v970_v31, %v1092_v49  ;;  %v2644_v31 = vld [vmem:[%s2840_s6] ss:$0 sm:$0xff] }
 0x255   : > { %v1123_v35 = vsel %vm1059_vm3, %v965_v33, %v1091_v34  ;;  %v2650_v34 = vld [vmem:[%s2841_s7] ss:$0 sm:$0xff] }
 0x256   : > { %v1963_v36 = vpop.f32.mrf.mxu1  ;;  %2022 = vmatprep.mubr.msk.f32.mxu1 %vm1154_vm2, %v1123_v35 }
 0x257   : > { %v980_v38 = vadd.f32 %v1963_v36, %v2573_v28  ;;  %2023 = vmatmul.mubr.msk.f32.gmra.mxu1 %vm1154_vm2, %v1124_v37  ;;  %v2656_v37 = vld [vmem:[%s2842_s8] ss:$0 sm:$0xff] }
 0x258   : > { %v974_v39 = vpop.f32.mrf.mxu1 }
 0x259   : > { %v975_v40 = vadd.f32 %v2573_v28, %v974_v39  ;;  %v1094_v41 = vmul.f32 0.2, %v980_v38  ;;  %vm1062_vm4 = vcmp.gt.f32.partialorder %v980_v38, 0.0 }
 0x25b   : > { %vm1061_vm5 = vcmp.gt.f32.partialorder %v975_v40, 0.0  ;;  %v1093_v42 = vmul.f32 0.2, %v975_v40  ;;  %v1126_v45 = vsel %vm1062_vm4, %v980_v38, %v1094_v41 }
 0x25d   : > { %v1125_v43 = vsel %vm1061_vm5, %v975_v40, %v1093_v42 }
 0x25e   : > { %v1966_v44 = vpop.f32.mrf.mxu1  ;;  %2025 = vmatprep.mubr.msk.f32.mxu1 %vm1154_vm2, %v1125_v43 }
 0x25f   : > { %v990_v46 = vadd.f32 %v1966_v44, %v2573_v28  ;;  %2026 = vmatmul.mubr.msk.f32.gmra.mxu1 %vm1154_vm2, %v1126_v45 }
 0x260   : > { %v984_v47 = vpop.f32.mrf.mxu1 }
 0x261   : > { %v985_v48 = vadd.f32 %v2573_v28, %v984_v47  ;;  %v1096_v50 = vmul.f32 0.2, %v990_v46  ;;  %vm1064_vm6 = vcmp.gt.f32.partialorder %v990_v46, 0.0 }
 0x263   : > { %vm1063_vm7 = vcmp.gt.f32.partialorder %v985_v48, 0.0  ;;  %v1095_v51 = vmul.f32 0.2, %v985_v48  ;;  %v1128_v54 = vsel %vm1064_vm6, %v990_v46, %v1096_v50 }
 0x265   : > { %v1127_v52 = vsel %vm1063_vm7, %v985_v48, %v1095_v51 }
 0x266   : > { %v1969_v53 = vpop.f32.mrf.mxu1  ;;  %2028 = vmatprep.mubr.msk.f32.mxu1 %vm1154_vm2, %v1127_v52 }
 0x267   : > { %v1000_v55 = vadd.f32 %v1969_v53, %v2573_v28  ;;  %2029 = vmatmul.mubr.msk.f32.gmra.mxu1 %vm1154_vm2, %v1128_v54 }
 0x268   : > { %v994_v56 = vpop.f32.mrf.mxu1 }
 0x269   : > { %v995_v57 = vadd.f32 %v2573_v28, %v994_v56  ;;  %v1098_v58 = vmul.f32 0.2, %v1000_v55  ;;  %vm1066_vm8 = vcmp.gt.f32.partialorder %v1000_v55, 0.0 }
 0x26b   : > { %vm1065_vm9 = vcmp.gt.f32.partialorder %v995_v57, 0.0  ;;  %v1097_v59 = vmul.f32 0.2, %v995_v57  ;;  %v1130_v62 = vsel %vm1066_vm8, %v1000_v55, %v1098_v58 }
 0x26d   : > { %v1129_v60 = vsel %vm1065_vm9, %v995_v57, %v1097_v59 }
 0x26e   : > { %v1972_v61 = vpop.f32.mrf.mxu1  ;;  %2031 = vmatprep.mubr.msk.f32.mxu1 %vm1154_vm2, %v1129_v60 }
 0x26f   : > { %v1010_v63 = vadd.f32 %v1972_v61, %v2573_v28  ;;  %2032 = vmatmul.mubr.msk.f32.gmra.mxu1 %vm1154_vm2, %v1130_v62 }
 0x270   : > { %v1004_v0 = vpop.f32.mrf.mxu1 }
 0x271   : > { %v1005_v1 = vadd.f32 %v2573_v28, %v1004_v0  ;;  %v1100_v2 = vmul.f32 0.2, %v1010_v63  ;;  %vm1068_vm10 = vcmp.gt.f32.partialorder %v1010_v63, 0.0 }
 0x273   : > { %vm1067_vm11 = vcmp.gt.f32.partialorder %v1005_v1, 0.0  ;;  %v1099_v3 = vmul.f32 0.2, %v1005_v1  ;;  %v1132_v6 = vsel %vm1068_vm10, %v1010_v63, %v1100_v2 }
 0x275   : > { %v1131_v4 = vsel %vm1067_vm11, %v1005_v1, %v1099_v3 }
 0x276   : > { %v1975_v5 = vpop.f32.mrf.mxu1  ;;  %2034 = vmatprep.mubr.msk.f32.mxu1 %vm1154_vm2, %v1131_v4 }
 0x277   : > { %v1020_v7 = vadd.f32 %v1975_v5, %v2573_v28  ;;  %2035 = vmatmul.mubr.msk.f32.gmra.mxu1 %vm1154_vm2, %v1132_v6 }
 0x278   : > { %v1014_v8 = vpop.f32.mrf.mxu1 }
 0x279   : > { %v1015_v9 = vadd.f32 %v2573_v28, %v1014_v8  ;;  %v1102_v10 = vmul.f32 0.2, %v1020_v7  ;;  %vm1070_vm12 = vcmp.gt.f32.partialorder %v1020_v7, 0.0 }
 0x27b   : > { %vm1069_vm13 = vcmp.gt.f32.partialorder %v1015_v9, 0.0  ;;  %v1101_v11 = vmul.f32 0.2, %v1015_v9  ;;  %v1134_v14 = vsel %vm1070_vm12, %v1020_v7, %v1102_v10 }
 0x27d   : > { %v1133_v12 = vsel %vm1069_vm13, %v1015_v9, %v1101_v11 }
 0x27e   : > { %v1978_v13 = vpop.f32.mrf.mxu1  ;;  %2037 = vmatprep.mubr.msk.f32.mxu1 %vm1154_vm2, %v1133_v12 }
 0x27f   : > { %v1030_v15 = vadd.f32 %v1978_v13, %v2573_v28  ;;  %2038 = vmatmul.mubr.msk.f32.gmra.mxu1 %vm1154_vm2, %v1134_v14 }
 0x280   : > { %v1024_v16 = vpop.f32.mrf.mxu1 }
 0x281   : > { %v1025_v17 = vadd.f32 %v2573_v28, %v1024_v16  ;;  %v1104_v18 = vmul.f32 0.2, %v1030_v15  ;;  %vm1072_vm14 = vcmp.gt.f32.partialorder %v1030_v15, 0.0 }
 0x283   : > { %vm1071_vm15 = vcmp.gt.f32.partialorder %v1025_v17, 0.0  ;;  %v1103_v19 = vmul.f32 0.2, %v1025_v17  ;;  %v1136_v22 = vsel %vm1072_vm14, %v1030_v15, %v1104_v18 }
 0x285   : > { %v1135_v20 = vsel %vm1071_vm15, %v1025_v17, %v1103_v19 }
 0x286   : > { %v1981_v21 = vpop.f32.mrf.mxu1  ;;  %2040 = vmatprep.mubr.msk.f32.mxu1 %vm1154_vm2, %v1135_v20 }
 0x287   : > { %v1040_v23 = vadd.f32 %v1981_v21, %v2573_v28  ;;  %2041 = vmatmul.mubr.msk.f32.gmra.mxu1 %vm1154_vm2, %v1136_v22 }
 0x288   : > { %v1034_v24 = vpop.f32.mrf.mxu1 }
 0x289   : > { %v1035_v25 = vadd.f32 %v2573_v28, %v1034_v24  ;;  %v1106_v26 = vmul.f32 0.2, %v1040_v23  ;;  %vm1074_vm0 = vcmp.gt.f32.partialorder %v1040_v23, 0.0 }
 0x28b   : > { %vm1073_vm1 = vcmp.gt.f32.partialorder %v1035_v25, 0.0  ;;  %v1105_v27 = vmul.f32 0.2, %v1035_v25  ;;  %v1138_v30 = vsel %vm1074_vm0, %v1040_v23, %v1106_v26 }
 0x28d   : > { %v1137_v29 = vsel %vm1073_vm1, %v1035_v25, %v1105_v27 }
 0x28e   : > { %2043 = vmatprep.mubr.msk.f32.mxu1 %vm1154_vm2, %v1137_v29 }
 0x28f   : > { %2044 = vmatmul.mubr.msk.f32.gmra.mxu1 %vm1154_vm2, %v1138_v30 }
 0x2d7   : > { %v2000_v28 = vpop.f32.mrf.mxu1 }
 0x2d8   : > { %v1323_v32 = vadd.f32 %v2000_v28, %v2644_v31 }
 0x2d9   : > { %v1317_v33 = vpop.f32.mrf.mxu1 }
 0x2da   : > { %vm1477_vm3 = vcmp.gt.f32.partialorder %v1323_v32, 0.0  ;;  %v1509_v49 = vmul.f32 0.2, %v1323_v32  ;;  %v1318_v35 = vadd.f32 %v2644_v31, %v1317_v33 }
 0x2dc   : > { %v1541_v36 = vsel %vm1477_vm3, %v1323_v32, %v1509_v49  ;;  %vm1476_vm4 = vcmp.gt.f32.partialorder %v1318_v35, 0.0  ;;  %v1508_v38 = vmul.f32 0.2, %v1318_v35 }
 0x2dd   : > { %v1580_v39 = vmul.f32 %v2650_v34, %v1541_v36 }
 0x2de   : > { %v1540_v40 = vsel %vm1476_vm4, %v1318_v35, %v1508_v38 }
 0x2df   : > { %v1619_v41 = vadd.f32 %v2656_v37, %v1580_v39  ;;  %v1579_v42 = vmul.f32 %v2650_v34, %v1540_v40  ;;  %v2003_v43 = vpop.f32.mrf.mxu1 }
 0x2e0   : > { %v1333_v44 = vadd.f32 %v2003_v43, %v2644_v31 }
 0x2e1   : > { %1651 = vst.msk [vmem:[%s2662_s13 + $0x8] sm:$0xff] %vm1154_vm2, %v1619_v41  ;;  %v1618_v45 = vadd.f32 %v2656_v37, %v1579_v42  ;;  %v1327_v46 = vpop.f32.mrf.mxu1 }
 0x2e2   : > { %vm1479_vm5 = vcmp.gt.f32.partialorder %v1333_v44, 0.0  ;;  %v1511_v47 = vmul.f32 0.2, %v1333_v44  ;;  %v1328_v48 = vadd.f32 %v2644_v31, %v1327_v46 }
 0x2e3   : > { %1650 = vst.msk [vmem:[%s2662_s13] sm:$0xff] %vm1154_vm2, %v1618_v45 }
 0x2e4   : > { %v1543_v50 = vsel %vm1479_vm5, %v1333_v44, %v1511_v47  ;;  %vm1478_vm6 = vcmp.gt.f32.partialorder %v1328_v48, 0.0  ;;  %v1510_v51 = vmul.f32 0.2, %v1328_v48 }
 0x2e5   : > { %v1582_v52 = vmul.f32 %v2650_v34, %v1543_v50 }
 0x2e6   : > { %v1542_v53 = vsel %vm1478_vm6, %v1328_v48, %v1510_v51 }
 0x2e7   : > { %v1621_v54 = vadd.f32 %v2656_v37, %v1582_v52  ;;  %v1581_v55 = vmul.f32 %v2650_v34, %v1542_v53  ;;  %v2006_v56 = vpop.f32.mrf.mxu1 }
 0x2e8   : > { %v1343_v57 = vadd.f32 %v2006_v56, %v2644_v31 }
 0x2e9   : > { %1653 = vst.msk [vmem:[%s2662_s13 + $0x18] sm:$0xff] %vm1154_vm2, %v1621_v54  ;;  %v1620_v58 = vadd.f32 %v2656_v37, %v1581_v55  ;;  %v1337_v59 = vpop.f32.mrf.mxu1 }
 0x2ea   : > { %vm1481_vm7 = vcmp.gt.f32.partialorder %v1343_v57, 0.0  ;;  %v1513_v60 = vmul.f32 0.2, %v1343_v57  ;;  %v1338_v61 = vadd.f32 %v2644_v31, %v1337_v59 }
 0x2eb   : > { %1652 = vst.msk [vmem:[%s2662_s13 + $0x10] sm:$0xff] %vm1154_vm2, %v1620_v58 }
 0x2ec   : > { %v1545_v62 = vsel %vm1481_vm7, %v1343_v57, %v1513_v60  ;;  %vm1480_vm8 = vcmp.gt.f32.partialorder %v1338_v61, 0.0  ;;  %v1512_v63 = vmul.f32 0.2, %v1338_v61 }
 0x2ed   : > { %v1584_v0 = vmul.f32 %v2650_v34, %v1545_v62 }
 0x2ee   : > { %v1544_v1 = vsel %vm1480_vm8, %v1338_v61, %v1512_v63 }
 0x2ef   : > { %v1623_v2 = vadd.f32 %v2656_v37, %v1584_v0  ;;  %v1583_v3 = vmul.f32 %v2650_v34, %v1544_v1  ;;  %v2009_v4 = vpop.f32.mrf.mxu1 }
 0x2f0   : > { %v1353_v5 = vadd.f32 %v2009_v4, %v2644_v31 }
 0x2f1   : > { %1655 = vst.msk [vmem:[%s2662_s13 + $0x28] sm:$0xff] %vm1154_vm2, %v1623_v2  ;;  %v1622_v6 = vadd.f32 %v2656_v37, %v1583_v3  ;;  %v1347_v7 = vpop.f32.mrf.mxu1 }
 0x2f2   : > { %vm1483_vm9 = vcmp.gt.f32.partialorder %v1353_v5, 0.0  ;;  %v1515_v8 = vmul.f32 0.2, %v1353_v5  ;;  %v1348_v9 = vadd.f32 %v2644_v31, %v1347_v7 }
 0x2f3   : > { %1654 = vst.msk [vmem:[%s2662_s13 + $0x20] sm:$0xff] %vm1154_vm2, %v1622_v6 }
 0x2f4   : > { %v1547_v10 = vsel %vm1483_vm9, %v1353_v5, %v1515_v8  ;;  %vm1482_vm10 = vcmp.gt.f32.partialorder %v1348_v9, 0.0  ;;  %v1514_v11 = vmul.f32 0.2, %v1348_v9 }
 0x2f5   : > { %v1586_v12 = vmul.f32 %v2650_v34, %v1547_v10 }
 0x2f6   : > { %v1546_v13 = vsel %vm1482_vm10, %v1348_v9, %v1514_v11 }
 0x2f7   : > { %v1625_v14 = vadd.f32 %v2656_v37, %v1586_v12  ;;  %v1585_v15 = vmul.f32 %v2650_v34, %v1546_v13  ;;  %v2012_v16 = vpop.f32.mrf.mxu1 }
 0x2f8   : > { %v1363_v17 = vadd.f32 %v2012_v16, %v2644_v31 }
 0x2f9   : > { %1657 = vst.msk [vmem:[%s2662_s13 + $0x38] sm:$0xff] %vm1154_vm2, %v1625_v14  ;;  %v1624_v18 = vadd.f32 %v2656_v37, %v1585_v15  ;;  %v1357_v19 = vpop.f32.mrf.mxu1 }
 0x2fa   : > { %vm1485_vm11 = vcmp.gt.f32.partialorder %v1363_v17, 0.0  ;;  %v1517_v20 = vmul.f32 0.2, %v1363_v17  ;;  %v1358_v21 = vadd.f32 %v2644_v31, %v1357_v19 }
 0x2fb   : > { %1656 = vst.msk [vmem:[%s2662_s13 + $0x30] sm:$0xff] %vm1154_vm2, %v1624_v18 }
 0x2fc   : > { %v1549_v22 = vsel %vm1485_vm11, %v1363_v17, %v1517_v20  ;;  %vm1484_vm12 = vcmp.gt.f32.partialorder %v1358_v21, 0.0  ;;  %v1516_v23 = vmul.f32 0.2, %v1358_v21 }
 0x2fd   : > { %v1588_v24 = vmul.f32 %v2650_v34, %v1549_v22 }
 0x2fe   : > { %v1548_v25 = vsel %vm1484_vm12, %v1358_v21, %v1516_v23 }
 0x2ff   : > { %v1627_v26 = vadd.f32 %v2656_v37, %v1588_v24  ;;  %v1587_v27 = vmul.f32 %v2650_v34, %v1548_v25  ;;  %v2015_v29 = vpop.f32.mrf.mxu1 }
 0x300   : > { %v1373_v30 = vadd.f32 %v2015_v29, %v2644_v31 }
 0x301   : > { %1659 = vst.msk [vmem:[%s2662_s13 + $0x48] sm:$0xff] %vm1154_vm2, %v1627_v26  ;;  %v1626_v28 = vadd.f32 %v2656_v37, %v1587_v27  ;;  %v1367_v32 = vpop.f32.mrf.mxu1 }
 0x302   : > { %vm1487_vm13 = vcmp.gt.f32.partialorder %v1373_v30, 0.0  ;;  %v1519_v33 = vmul.f32 0.2, %v1373_v30  ;;  %v1368_v49 = vadd.f32 %v2644_v31, %v1367_v32 }
 0x303   : > { %1658 = vst.msk [vmem:[%s2662_s13 + $0x40] sm:$0xff] %vm1154_vm2, %v1626_v28 }
 0x304   : > { %v1551_v35 = vsel %vm1487_vm13, %v1373_v30, %v1519_v33  ;;  %vm1486_vm14 = vcmp.gt.f32.partialorder %v1368_v49, 0.0  ;;  %v1518_v36 = vmul.f32 0.2, %v1368_v49 }
 0x305   : > { %v1590_v38 = vmul.f32 %v2650_v34, %v1551_v35 }
 0x306   : > { %v1550_v39 = vsel %vm1486_vm14, %v1368_v49, %v1518_v36 }
 0x307   : > { %v1629_v40 = vadd.f32 %v2656_v37, %v1590_v38  ;;  %v1589_v41 = vmul.f32 %v2650_v34, %v1550_v39  ;;  %v2018_v42 = vpop.f32.mrf.mxu1 }
 0x308   : > { %v1383_v43 = vadd.f32 %v2018_v42, %v2644_v31 }
 0x309   : > { %1661 = vst.msk [vmem:[%s2662_s13 + $0x58] sm:$0xff] %vm1154_vm2, %v1629_v40  ;;  %v1628_v44 = vadd.f32 %v2656_v37, %v1589_v41  ;;  %v1377_v45 = vpop.f32.mrf.mxu1 }
 0x30a   : > { %vm1489_vm15 = vcmp.gt.f32.partialorder %v1383_v43, 0.0  ;;  %v1521_v46 = vmul.f32 0.2, %v1383_v43  ;;  %v1378_v47 = vadd.f32 %v2644_v31, %v1377_v45 }
 0x30b   : > { %1660 = vst.msk [vmem:[%s2662_s13 + $0x50] sm:$0xff] %vm1154_vm2, %v1628_v44 }
 0x30c   : > { %v1553_v48 = vsel %vm1489_vm15, %v1383_v43, %v1521_v46  ;;  %vm1488_vm0 = vcmp.gt.f32.partialorder %v1378_v47, 0.0  ;;  %v1520_v50 = vmul.f32 0.2, %v1378_v47 }
 0x30d   : > { %v1592_v51 = vmul.f32 %v2650_v34, %v1553_v48 }
 0x30e   : > { %v1552_v52 = vsel %vm1488_vm0, %v1378_v47, %v1520_v50 }
 0x30f   : > { %v1631_v53 = vadd.f32 %v2656_v37, %v1592_v51  ;;  %v1591_v54 = vmul.f32 %v2650_v34, %v1552_v52  ;;  %v2021_v55 = vpop.f32.mrf.mxu1 }
 0x310   : > { %v1393_v56 = vadd.f32 %v2021_v55, %v2644_v31 }
 0x311   : > { %1663 = vst.msk [vmem:[%s2662_s13 + $0x68] sm:$0xff] %vm1154_vm2, %v1631_v53  ;;  %v1630_v57 = vadd.f32 %v2656_v37, %v1591_v54  ;;  %v1387_v58 = vpop.f32.mrf.mxu1 }
 0x312   : > { %vm1491_vm1 = vcmp.gt.f32.partialorder %v1393_v56, 0.0  ;;  %v1523_v59 = vmul.f32 0.2, %v1393_v56  ;;  %v1388_v60 = vadd.f32 %v2644_v31, %v1387_v58 }
 0x313   : > { %1662 = vst.msk [vmem:[%s2662_s13 + $0x60] sm:$0xff] %vm1154_vm2, %v1630_v57 }
 0x314   : > { %v1555_v61 = vsel %vm1491_vm1, %v1393_v56, %v1523_v59  ;;  %vm1490_vm3 = vcmp.gt.f32.partialorder %v1388_v60, 0.0  ;;  %v1522_v62 = vmul.f32 0.2, %v1388_v60 }
 0x315   : > { %v1594_v63 = vmul.f32 %v2650_v34, %v1555_v61 }
 0x316   : > { %v1554_v0 = vsel %vm1490_vm3, %v1388_v60, %v1522_v62 }
 0x317   : > { %v1633_v1 = vadd.f32 %v2656_v37, %v1594_v63  ;;  %v1593_v2 = vmul.f32 %v2650_v34, %v1554_v0  ;;  %v2024_v3 = vpop.f32.mrf.mxu1 }
 0x318   : > { %v1403_v4 = vadd.f32 %v2024_v3, %v2644_v31 }
 0x319   : > { %1665 = vst.msk [vmem:[%s2662_s13 + $0x78] sm:$0xff] %vm1154_vm2, %v1633_v1  ;;  %v1632_v5 = vadd.f32 %v2656_v37, %v1593_v2  ;;  %v1397_v6 = vpop.f32.mrf.mxu1 }
 0x31a   : > { %vm1493_vm4 = vcmp.gt.f32.partialorder %v1403_v4, 0.0  ;;  %v1525_v7 = vmul.f32 0.2, %v1403_v4  ;;  %v1398_v8 = vadd.f32 %v2644_v31, %v1397_v6 }
 0x31b   : > { %1664 = vst.msk [vmem:[%s2662_s13 + $0x70] sm:$0xff] %vm1154_vm2, %v1632_v5 }
 0x31c   : > { %v1557_v9 = vsel %vm1493_vm4, %v1403_v4, %v1525_v7  ;;  %vm1492_vm5 = vcmp.gt.f32.partialorder %v1398_v8, 0.0  ;;  %v1524_v10 = vmul.f32 0.2, %v1398_v8 }
 0x31d   : > { %v1596_v11 = vmul.f32 %v2650_v34, %v1557_v9 }
 0x31e   : > { %v1556_v12 = vsel %vm1492_vm5, %v1398_v8, %v1524_v10 }
 0x31f   : > { %v1635_v13 = vadd.f32 %v2656_v37, %v1596_v11  ;;  %v1595_v14 = vmul.f32 %v2650_v34, %v1556_v12  ;;  %v2027_v15 = vpop.f32.mrf.mxu1 }
 0x320   : > { %v1413_v16 = vadd.f32 %v2027_v15, %v2644_v31 }
 0x321   : > { %1667 = vst.msk [vmem:[%s2662_s13 + $0x88] sm:$0xff] %vm1154_vm2, %v1635_v13  ;;  %v1634_v17 = vadd.f32 %v2656_v37, %v1595_v14  ;;  %v1407_v18 = vpop.f32.mrf.mxu1 }
 0x322   : > { %vm1495_vm6 = vcmp.gt.f32.partialorder %v1413_v16, 0.0  ;;  %v1527_v19 = vmul.f32 0.2, %v1413_v16  ;;  %v1408_v20 = vadd.f32 %v2644_v31, %v1407_v18 }
 0x323   : > { %1666 = vst.msk [vmem:[%s2662_s13 + $0x80] sm:$0xff] %vm1154_vm2, %v1634_v17 }
 0x324   : > { %v1559_v21 = vsel %vm1495_vm6, %v1413_v16, %v1527_v19  ;;  %vm1494_vm7 = vcmp.gt.f32.partialorder %v1408_v20, 0.0  ;;  %v1526_v22 = vmul.f32 0.2, %v1408_v20 }
 0x325   : > { %v1598_v23 = vmul.f32 %v2650_v34, %v1559_v21 }
 0x326   : > { %v1558_v24 = vsel %vm1494_vm7, %v1408_v20, %v1526_v22 }
 0x327   : > { %v1637_v25 = vadd.f32 %v2656_v37, %v1598_v23  ;;  %v1597_v26 = vmul.f32 %v2650_v34, %v1558_v24  ;;  %v2030_v27 = vpop.f32.mrf.mxu1 }
 0x328   : > { %v1423_v29 = vadd.f32 %v2030_v27, %v2644_v31 }
 0x329   : > { %1669 = vst.msk [vmem:[%s2662_s13 + $0x98] sm:$0xff] %vm1154_vm2, %v1637_v25  ;;  %v1636_v30 = vadd.f32 %v2656_v37, %v1597_v26  ;;  %v1417_v28 = vpop.f32.mrf.mxu1 }
 0x32a   : > { %vm1497_vm8 = vcmp.gt.f32.partialorder %v1423_v29, 0.0  ;;  %v1529_v32 = vmul.f32 0.2, %v1423_v29  ;;  %v1418_v33 = vadd.f32 %v2644_v31, %v1417_v28 }
 0x32b   : > { %1668 = vst.msk [vmem:[%s2662_s13 + $0x90] sm:$0xff] %vm1154_vm2, %v1636_v30 }
 0x32c   : > { %v1561_v49 = vsel %vm1497_vm8, %v1423_v29, %v1529_v32  ;;  %vm1496_vm9 = vcmp.gt.f32.partialorder %v1418_v33, 0.0  ;;  %v1528_v35 = vmul.f32 0.2, %v1418_v33 }
 0x32d   : > { %v1600_v36 = vmul.f32 %v2650_v34, %v1561_v49 }
 0x32e   : > { %v1560_v38 = vsel %vm1496_vm9, %v1418_v33, %v1528_v35 }
 0x32f   : > { %v1639_v39 = vadd.f32 %v2656_v37, %v1600_v36  ;;  %v1599_v40 = vmul.f32 %v2650_v34, %v1560_v38  ;;  %v2033_v41 = vpop.f32.mrf.mxu1 }
 0x330   : > { %v1433_v42 = vadd.f32 %v2033_v41, %v2644_v31 }
 0x331   : > { %1671 = vst.msk [vmem:[%s2662_s13 + $0xa8] sm:$0xff] %vm1154_vm2, %v1639_v39  ;;  %v1638_v43 = vadd.f32 %v2656_v37, %v1599_v40  ;;  %v1427_v44 = vpop.f32.mrf.mxu1 }
 0x332   : > { %vm1499_vm10 = vcmp.gt.f32.partialorder %v1433_v42, 0.0  ;;  %v1531_v45 = vmul.f32 0.2, %v1433_v42  ;;  %v1428_v46 = vadd.f32 %v2644_v31, %v1427_v44 }
 0x333   : > { %1670 = vst.msk [vmem:[%s2662_s13 + $0xa0] sm:$0xff] %vm1154_vm2, %v1638_v43 }
 0x334   : > { %v1563_v47 = vsel %vm1499_vm10, %v1433_v42, %v1531_v45  ;;  %vm1498_vm11 = vcmp.gt.f32.partialorder %v1428_v46, 0.0  ;;  %v1530_v48 = vmul.f32 0.2, %v1428_v46 }
 0x335   : > { %v1602_v50 = vmul.f32 %v2650_v34, %v1563_v47 }
 0x336   : > { %v1562_v51 = vsel %vm1498_vm11, %v1428_v46, %v1530_v48 }
 0x337   : > { %v1641_v52 = vadd.f32 %v2656_v37, %v1602_v50  ;;  %v1601_v53 = vmul.f32 %v2650_v34, %v1562_v51  ;;  %v2036_v54 = vpop.f32.mrf.mxu1 }
 0x338   : > { %v1443_v55 = vadd.f32 %v2036_v54, %v2644_v31 }
 0x339   : > { %1673 = vst.msk [vmem:[%s2662_s13 + $0xb8] sm:$0xff] %vm1154_vm2, %v1641_v52  ;;  %v1640_v56 = vadd.f32 %v2656_v37, %v1601_v53  ;;  %v1437_v57 = vpop.f32.mrf.mxu1 }
 0x33a   : > { %vm1501_vm12 = vcmp.gt.f32.partialorder %v1443_v55, 0.0  ;;  %v1533_v58 = vmul.f32 0.2, %v1443_v55  ;;  %v1438_v59 = vadd.f32 %v2644_v31, %v1437_v57 }
 0x33b   : > { %1672 = vst.msk [vmem:[%s2662_s13 + $0xb0] sm:$0xff] %vm1154_vm2, %v1640_v56 }
 0x33c   : > { %v1565_v60 = vsel %vm1501_vm12, %v1443_v55, %v1533_v58  ;;  %vm1500_vm13 = vcmp.gt.f32.partialorder %v1438_v59, 0.0  ;;  %v1532_v61 = vmul.f32 0.2, %v1438_v59 }
 0x33d   : > { %v1604_v62 = vmul.f32 %v2650_v34, %v1565_v60 }
 0x33e   : > { %v1564_v63 = vsel %vm1500_vm13, %v1438_v59, %v1532_v61 }
 0x33f   : > { %v1643_v0 = vadd.f32 %v2656_v37, %v1604_v62  ;;  %v1603_v1 = vmul.f32 %v2650_v34, %v1564_v63  ;;  %v2039_v2 = vpop.f32.mrf.mxu1 }
 0x340   : > { %v1453_v3 = vadd.f32 %v2039_v2, %v2644_v31 }
 0x341   : > { %1675 = vst.msk [vmem:[%s2662_s13 + $0xc8] sm:$0xff] %vm1154_vm2, %v1643_v0  ;;  %v1642_v4 = vadd.f32 %v2656_v37, %v1603_v1  ;;  %v1447_v5 = vpop.f32.mrf.mxu1 }
 0x342   : > { %vm1503_vm14 = vcmp.gt.f32.partialorder %v1453_v3, 0.0  ;;  %v1535_v6 = vmul.f32 0.2, %v1453_v3  ;;  %v1448_v7 = vadd.f32 %v2644_v31, %v1447_v5 }
 0x343   : > { %1674 = vst.msk [vmem:[%s2662_s13 + $0xc0] sm:$0xff] %vm1154_vm2, %v1642_v4 }
 0x344   : > { %v1567_v8 = vsel %vm1503_vm14, %v1453_v3, %v1535_v6  ;;  %vm1502_vm15 = vcmp.gt.f32.partialorder %v1448_v7, 0.0  ;;  %v1534_v9 = vmul.f32 0.2, %v1448_v7 }
 0x345   : > { %v1606_v10 = vmul.f32 %v2650_v34, %v1567_v8 }
 0x346   : > { %v1566_v11 = vsel %vm1502_vm15, %v1448_v7, %v1534_v9 }
 0x347   : > { %v1645_v12 = vadd.f32 %v2656_v37, %v1606_v10  ;;  %v1605_v13 = vmul.f32 %v2650_v34, %v1566_v11  ;;  %v2042_v14 = vpop.f32.mrf.mxu1 }
 0x348   : > { %v1463_v15 = vadd.f32 %v2042_v14, %v2644_v31 }
 0x349   : > { %1677 = vst.msk [vmem:[%s2662_s13 + $0xd8] sm:$0xff] %vm1154_vm2, %v1645_v12  ;;  %v1644_v16 = vadd.f32 %v2656_v37, %v1605_v13  ;;  %v1457_v17 = vpop.f32.mrf.mxu1 }
 0x34a   : > { %vm1505_vm0 = vcmp.gt.f32.partialorder %v1463_v15, 0.0  ;;  %v1537_v18 = vmul.f32 0.2, %v1463_v15  ;;  %v1458_v19 = vadd.f32 %v2644_v31, %v1457_v17 }
 0x34b   : > { %1676 = vst.msk [vmem:[%s2662_s13 + $0xd0] sm:$0xff] %vm1154_vm2, %v1644_v16 }
 0x34c   : > { %v1569_v20 = vsel %vm1505_vm0, %v1463_v15, %v1537_v18  ;;  %vm1504_vm1 = vcmp.gt.f32.partialorder %v1458_v19, 0.0  ;;  %v1536_v21 = vmul.f32 0.2, %v1458_v19 }
 0x34d   : > { %v1608_v22 = vmul.f32 %v2650_v34, %v1569_v20 }
 0x34e   : > { %v1568_v23 = vsel %vm1504_vm1, %v1458_v19, %v1536_v21 }
 0x34f   : > { %v1647_v24 = vadd.f32 %v2656_v37, %v1608_v22  ;;  %v1607_v25 = vmul.f32 %v2650_v34, %v1568_v23  ;;  %v2045_v26 = vpop.f32.mrf.mxu1 }
 0x350   : > { %v1473_v27 = vadd.f32 %v2045_v26, %v2644_v31 }
 0x351   : > { %1679 = vst.msk [vmem:[%s2662_s13 + $0xe8] sm:$0xff] %vm1154_vm2, %v1647_v24  ;;  %v1646_v29 = vadd.f32 %v2656_v37, %v1607_v25  ;;  %v1467_v30 = vpop.f32.mrf.mxu1 }
 0x352   : > { %vm1507_vm3 = vcmp.gt.f32.partialorder %v1473_v27, 0.0  ;;  %v1539_v28 = vmul.f32 0.2, %v1473_v27  ;;  %v1468_v32 = vadd.f32 %v2644_v31, %v1467_v30 }
 0x353   : > { %1678 = vst.msk [vmem:[%s2662_s13 + $0xe0] sm:$0xff] %vm1154_vm2, %v1646_v29 }
 0x354   : > { %v1571_v33 = vsel %vm1507_vm3, %v1473_v27, %v1539_v28  ;;  %vm1506_vm4 = vcmp.gt.f32.partialorder %v1468_v32, 0.0  ;;  %v1538_v49 = vmul.f32 0.2, %v1468_v32 }
 0x355   : > { %v1610_v35 = vmul.f32 %v2650_v34, %v1571_v33 }
 0x356   : > { %v1570_v36 = vsel %vm1506_vm4, %v1468_v32, %v1538_v49 }
 0x357   : > { %v1649_v38 = vadd.f32 %v2656_v37, %v1610_v35  ;;  %v1609_v39 = vmul.f32 %v2650_v34, %v1570_v36 }
 0x359   : > { %1681 = vst.msk [vmem:[%s2662_s13 + $0xf8] sm:$0xff] %vm1154_vm2, %v1649_v38  ;;  %v1648_v40 = vadd.f32 %v2656_v37, %v1609_v39 }
 0x35b   : > { %1680 = vst.msk [vmem:[%s2662_s13 + $0xf0] sm:$0xff] %vm1154_vm2, %v1648_v40 }
 0x35c PF: > { %s2861_s12 = sld [smem:[#allocation8_spill]]  ;;  %s2862_s30 = smov %s2185_s10 }
 0x35d   : > { %s2863_s10 = smov %s2189_s11  ;;  %s2864_s11 = smov %s2316_s28 }
 0x362   : > { %p20_p7 = scmp.ge.s32.totalorder %s2861_s12, 4  }
 0x364   :  { %22 = sbr.rel (!%p20_p7) target bundleno = 4 (0x4), region = 100 }
 0x369   :  { %1704 = vsyncpa [#allocation3], 1 }
 0x36a   :  { %1706 = vsyncpa [#allocation3 + $0x1], 1 }
 0x36b   :  { %1707 = vsyncpa [#allocation5], 1 }

</bundles_post_ra>
